<compile_context>
chip_gen: v7x
topology: tpu7x:2x2x1
jax: 0.10.0
libtpu: 0.0.40
codegen_flags: <defaults>
</compile_context>

<pallas_src>
import functools

import numpy as np
import jax
import jax.numpy as jnp
from jax.experimental import pallas as pl
from jax.experimental.pallas import tpu as pltpu

MXU_DTYPE = jnp.bfloat16
LANE = 128
SUB = 16          # bf16 sublane pack; all slab row offsets are aligned to this


def _ru(n, m):
    return ((n + m - 1) // m) * m


# ----------------------------------------------------------------------------
# Fused kernel: whole PLE forward, weights read from a single bf16 slab and a
# single f32 bias slab via static slices.
# ----------------------------------------------------------------------------
def _ple_kernel(x_ref, w_ref, b_ref, out_ref, *, plan):
    gw_pad = plan["gw_pad"]
    gep = plan["gep"]
    tdp = plan["tdp"]

    def matw(h, entry):
        r0, rows, cols = entry
        w = w_ref[pl.ds(r0, rows), pl.ds(0, cols)]
        return jnp.dot(h.astype(MXU_DTYPE), w, preferred_element_type=jnp.float32)

    def dense(h, entry, brow):
        cols = entry[2]
        return matw(h, entry) + b_ref[pl.ds(brow, 1), pl.ds(0, cols)]

    x = x_ref[...]                                          # (TB, Din_pad) bf16

    for lp in plan["layers"]:
        subs, brows, goff = lp["subs"], lp["brows"], lp["goff"]
        n_sub = len(subs)

        # -- sublayer 0: all experts' first Linear + all task gates in ONE matmul --
        y0 = dense(x, subs[0], brows[0])                    # (TB, C0_pad) f32
        g = y0[:, goff:goff + gep]                          # gate logits (pad cols = 0)

        if n_sub == 1:
            hg = jnp.maximum(y0[:, :gw_pad], 0.0)
        else:
            h = jnp.maximum(y0[:, :lp["ew0_pad"]], 0.0)
            for s in range(1, n_sub - 1):                   # block-diagonal sublayers
                h = jnp.maximum(dense(h, subs[s], brows[s]), 0.0)
            # last sublayer emits the gathered (task, expert-slot, H) layout directly
            hg = jnp.maximum(dense(h, subs[n_sub - 1], brows[n_sub - 1]), 0.0)

        # -- per-task softmax + gated mixture, all on the MXU --
        # Subtracting the row-wise max is a per-row constant -> per-group softmax exact.
        ge = jnp.exp(g - jnp.max(g, axis=-1, keepdims=True))        # (TB, GEP) f32
        tmp = matw(ge, plan["repg"])          # [gate values broadcast over H | group sums]
        num = tmp[:, :gw_pad]                               # (TB, GW_pad)
        den = tmp[:, gw_pad:gw_pad + tdp]                   # (TB, TDP) softmax denominators
        mix = matw(hg * num, plan["wsum"])                  # (TB, XW_pad) unnormalized mix
        recip = pl.reciprocal(den, approx=False)            # exact for PyTorch parity
        x = mix * matw(recip, plan["rept"])                 # (TB, XW_pad) next-layer input

    # -- towers: block-diagonal Linear+ReLU, then zero-padded lane-dense Linear --
    th = jnp.maximum(dense(x, plan["t1"], plan["t1_brow"]), 0.0)
    out = dense(th, plan["t2"], plan["t2_brow"])            # (TB, out_pad)
    out_ref[...] = out.astype(out_ref.dtype)


def ple_forward_fused(x, w_slab, b_slab, plan, dim_out, *, batch_tile=128):
    """Run the whole PLE forward in one pallas_call; returns per-task outputs."""
    B, din = x.shape
    din_pad = plan["din_pad"]
    out_pad = plan["out_pad"]
    tb = _ru(min(batch_tile, B), SUB)
    b_pad = _ru(B, tb)
    xp = jnp.zeros((b_pad, din_pad), MXU_DTYPE).at[:B, :din].set(x.astype(MXU_DTYPE))
    out = pl.pallas_call(
        functools.partial(_ple_kernel, plan=plan),
        out_shape=jax.ShapeDtypeStruct((b_pad, out_pad), jnp.float32),
        grid=(b_pad // tb,),
        in_specs=[
            pl.BlockSpec((tb, din_pad), lambda b: (b, 0)),
            # grid-invariant weight/bias slabs: constant index_map -> DMA'd once per core.
            # TODO(synk): at production sizes mark these pipeline_mode=pl.Buffered(1).
            pl.BlockSpec(w_slab.shape, lambda b: (0, 0)),
            pl.BlockSpec(b_slab.shape, lambda b: (0, 0)),
        ],
        out_specs=pl.BlockSpec((tb, out_pad), lambda b: (b, 0)),
        compiler_params=pltpu.CompilerParams(
            dimension_semantics=("parallel",),      # batch grid -> both TCs on v7x
            vmem_limit_bytes=32 * 1024 * 1024,
        ),
    )(xp, w_slab, b_slab)
    outs, off = [], 0
    for d in dim_out:
        outs.append(out[:B, off:off + d])
        off += d
    return outs


# ----------------------------------------------------------------------------
# Deterministic parameter construction (shapes follow the PyTorch module).
# nn.Linear stores (out, in) and computes x @ W.T; we store W as (in, out).
# ----------------------------------------------------------------------------
def init_linear(key, din, dout, scale=0.05):
    kw, kb = jax.random.split(key)
    w = scale * jax.random.normal(kw, (din, dout), jnp.float32)
    b = scale * jax.random.normal(kb, (dout,), jnp.float32)
    return (w, b)


def init_expert(key, din, dout, dim_hidden):
    dims = [din, *dim_hidden, dout]
    keys = jax.random.split(key, len(dims) - 1)
    return [init_linear(keys[i], dims[i], dims[i + 1]) for i in range(len(dims) - 1)]


def init_cgc(key, dim_in, dim_out, dim_hidden, shared_expert_num, unique_expert_num, task_num):
    k_sh, k_un, k_gate = jax.random.split(key, 3)
    shared_keys = jax.random.split(k_sh, shared_expert_num)
    shared = [init_expert(k, dim_in, dim_out, dim_hidden) for k in shared_keys]
    unique = []
    un_keys = jax.random.split(k_un, task_num * unique_expert_num)
    idx = 0
    for _ in range(task_num):
        task_experts = []
        for _ in range(unique_expert_num):
            task_experts.append(init_expert(un_keys[idx], dim_in, dim_out, dim_hidden))
            idx += 1
        unique.append(task_experts)
    gate_keys = jax.random.split(k_gate, task_num)
    gates = [init_linear(k, dim_in, shared_expert_num + unique_expert_num) for k in gate_keys]
    return {"shared": shared, "unique": unique, "gates": gates}


def init_ple(key, dim_in, dim_out, dim_hidden, shared_expert_num, unique_expert_num,
             task_num, ple_layers):
    k_nets, k_towers = jax.random.split(key)
    net_keys = jax.random.split(k_nets, ple_layers)
    ple_nets = []
    for i in range(ple_layers):
        layer_in = dim_in if i == 0 else task_num * dim_hidden[-1]
        ple_nets.append(init_cgc(net_keys[i], layer_in, dim_hidden[-1], dim_hidden,
                                 shared_expert_num, unique_expert_num, task_num))
    tower_keys = jax.random.split(k_towers, task_num)
    towers = []
    for i in range(task_num):
        k1, k2 = jax.random.split(tower_keys[i])
        towers.append([init_linear(k1, dim_hidden[-1], dim_hidden[-1]),
                       init_linear(k2, dim_hidden[-1], dim_out[i])])
    return {"ple_nets": ple_nets, "towers": towers}


# ----------------------------------------------------------------------------
# One-time host-side re-layout of all parameters into two slabs + a static plan.
# ----------------------------------------------------------------------------
def prepare_fused_params(params, dim_in, dim_hidden, dim_out,
                         shared_expert_num, unique_expert_num, task_num):
    S, U, T = shared_expert_num, unique_expert_num, task_num
    E = S + T * U                       # total experts per CGC layer
    Eg = S + U                          # experts seen by each task's gate
    H = dim_hidden[-1]
    n_sub = len(dim_hidden) + 1
    xw_pad = _ru(T * H, LANE)           # mixture / next-layer-input width (lane-dense)
    gw_pad = _ru(T * Eg * H, LANE)      # gathered expert-output width (lane-dense)
    out_pad = _ru(sum(dim_out), LANE)   # final output slab width (lane-dense)
    din_pad = _ru(dim_in, SUB)
    gep = _ru(T * Eg, SUB)              # gate-logit column-block width
    tdp = _ru(T, SUB)                   # softmax-denominator column-block width

    sel = [list(range(S)) + [S + j * U + i for i in range(U)] for j in range(T)]
    npf = lambda a: np.asarray(a, np.float32)

    weights, biases, layer_meta = [], [], []

    for l, cgc in enumerate(params["ple_nets"]):
        # expert order: shared_0..shared_{S-1}, task0_unique_0.., task1_unique_0.., ...
        experts = list(cgc["shared"])
        for task_experts in cgc["unique"]:
            experts.extend(task_experts)
        k_true = dim_in if l == 0 else T * H
        k_pad = din_pad if l == 0 else xw_pad
        d = [k_true, *dim_hidden, H]
        brows, goff, ew0_pad = [], None, None
        for s in range(n_sub):
            d_in, d_out = d[s], d[s + 1]
            last = (s == n_sub - 1)
            rows = k_pad if s == 0 else _ru(E * d_in, LANE)
            core = (T * Eg * H) if last else E * d_out
            core_pad = _ru(core, LANE)
            cols = core_pad
            if s == 0:
                goff, ew0_pad = core_pad, core_pad
                cols = _ru(core_pad + gep, LANE)
            w = np.zeros((rows, cols), np.float32)
            bv = np.zeros((cols,), np.float32)
            if not last:
                # straight concatenation (s==0) / block-diagonal (s>0)
                for e in range(E):
                    we, be = experts[e][s]
                    rs = 0 if s == 0 else e * d_in
                    w[rs:rs + d_in, e * d_out:(e + 1) * d_out] = npf(we)
                    bv[e * d_out:(e + 1) * d_out] = npf(be)
            else:
                # gathered layout: shared experts replicated per task (gather folded in)
                for j in range(T):
                    for ep, e in enumerate(sel[j]):
                        we, be = experts[e][s]
                        rs = 0 if s == 0 else e * d_in
                        c0 = (j * Eg + ep) * H
                        w[rs:rs + d_in, c0:c0 + H] = npf(we)
                        bv[c0:c0 + H] = npf(be)
            if s == 0:
                # fuse all task gates as extra output columns of sublayer 0
                for j in range(T):
                    gwt, gbt = cgc["gates"][j]
                    w[:k_true, goff + j * Eg:goff + (j + 1) * Eg] = npf(gwt)
                    bv[goff + j * Eg:goff + (j + 1) * Eg] = npf(gbt)
            weights.append(w)
            biases.append(bv)
            brows.append(len(biases) - 1)
        layer_meta.append(dict(goff=goff, ew0_pad=ew0_pad, brows=brows))

    # constant 0/1 "mixer" matrices shared by every CGC layer (exact in bf16)
    repg = np.zeros((gep, gw_pad + LANE), np.float32)
    for j in range(T):
        for ep in range(Eg):
            r = j * Eg + ep
            repg[r, r * H:(r + 1) * H] = 1.0        # broadcast gate r over its H lanes
            repg[r, gw_pad + j] = 1.0               # per-task group sum -> softmax denom
    repg[0, gw_pad + T:gw_pad + tdp] = 1.0          # keep padded denominators non-zero
    rept = np.zeros((tdp, xw_pad), np.float32)
    for j in range(T):
        rept[j, j * H:(j + 1) * H] = 1.0            # broadcast 1/denom_j over task j lanes
    wsum = np.zeros((gw_pad, xw_pad), np.float32)
    eye = np.eye(H, dtype=np.float32)
    for j in range(T):
        for ep in range(Eg):
            r = j * Eg + ep
            wsum[r * H:(r + 1) * H, j * H:(j + 1) * H] = eye   # sum expert slots per task

    # towers: block-diagonal Linear+ReLU, then zero-padded lane-dense Linear
    t1 = np.zeros((xw_pad, xw_pad), np.float32)
    t1b = np.zeros((xw_pad,), np.float32)
    t2 = np.zeros((xw_pad, out_pad), np.float32)
    t2b = np.zeros((out_pad,), np.float32)
    off = 0
    for j in range(T):
        (w1, b1), (w2, b2) = params["towers"][j]
        t1[j * H:(j + 1) * H, j * H:(j + 1) * H] = npf(w1)
        t1b[j * H:(j + 1) * H] = npf(b1)
        dout = npf(w2).shape[1]
        t2[j * H:(j + 1) * H, off:off + dout] = npf(w2)
        t2b[off:off + dout] = npf(b2)
        off += dout
    weights.extend([repg, rept, wsum, t1, t2])
    biases.append(t1b)
    t1_brow = len(biases) - 1
    biases.append(t2b)
    t2_brow = len(biases) - 1

    # pack all weight matrices into ONE bf16 slab (row offsets aligned to bf16 packing)
    max_c = max(w.shape[1] for w in weights)
    entries, r0 = [], 0
    for w in weights:
        entries.append((r0, w.shape[0], w.shape[1]))
        r0 += _ru(w.shape[0], SUB)
    w_slab = np.zeros((r0, max_c), np.float32)
    for (rr, rows, cols), w in zip(entries, weights):
        w_slab[rr:rr + rows, :cols] = w

    # all biases into ONE f32 slab, one row per Linear
    b_slab = np.zeros((_ru(len(biases), 8), max_c), np.float32)
    for i, b in enumerate(biases):
        b_slab[i, :b.shape[0]] = b

    idx = 0
    layers = []
    for meta in layer_meta:
        layers.append(dict(subs=[entries[idx + s] for s in range(n_sub)],
                           brows=meta["brows"], goff=meta["goff"],
                           ew0_pad=meta["ew0_pad"]))
        idx += n_sub
    plan = dict(layers=layers,
                repg=entries[idx], rept=entries[idx + 1], wsum=entries[idx + 2],
                t1=entries[idx + 3], t1_brow=t1_brow,
                t2=entries[idx + 4], t2_brow=t2_brow,
                gw_pad=gw_pad, xw_pad=xw_pad, out_pad=out_pad,
                din_pad=din_pad, gep=gep, tdp=tdp)
    return jnp.asarray(w_slab, MXU_DTYPE), jnp.asarray(b_slab, jnp.float32), plan


# ----------------------------------------------------------------------------
# Plain-JAX f32 reference (mirrors the PyTorch module) for a sanity check.
# ----------------------------------------------------------------------------
def _reference_forward(params, x, dim_hidden, task_num, ple_layers):
    def expert_fwd(ep, h):
        for w, b in ep:
            h = jnp.maximum(h @ w + b, 0.0)
        return h

    H = dim_hidden[-1]
    for l in range(ple_layers):
        cgc = params["ple_nets"][l]
        shared = [expert_fwd(p, x) for p in cgc["shared"]]
        feats = []
        for j in range(task_num):
            uniq = [expert_fwd(p, x) for p in cgc["unique"][j]]
            stacked = jnp.stack(shared + uniq, axis=-1)         # (B, D, E)
            gw, gb = cgc["gates"][j]
            gate = jax.nn.softmax(x @ gw + gb, axis=-1)         # (B, E)
            feats.append(jnp.einsum("bde,be->bd", stacked, gate))
        x = jnp.concatenate(feats, axis=1)
    outs = []
    for i in range(task_num):
        (w1, b1), (w2, b2) = params["towers"][i]
        h = jnp.maximum(x[:, i * H:(i + 1) * H] @ w1 + b1, 0.0)
        outs.append(h @ w2 + b2)
    return outs


# ----------------------------------------------------------------------------
if __name__ == "__main__":
    batch = 32
    dim_in = 16
    dim_hidden = [32, 32]
    dim_out = [4, 4]          # per-task output dims
    shared_expert_num = 2
    unique_expert_num = 2
    task_num = 2
    ple_layers = 2

    key = jax.random.PRNGKey(0)
    k_params, k_x = jax.random.split(key)

    params = init_ple(k_params, dim_in, dim_out, dim_hidden,
                      shared_expert_num, unique_expert_num, task_num, ple_layers)
    x = jax.random.normal(k_x, (batch, dim_in), jnp.float32)

    w_slab, b_slab, plan = prepare_fused_params(
        params, dim_in, dim_hidden, dim_out,
        shared_expert_num, unique_expert_num, task_num)

    outputs = ple_forward_fused(x, w_slab, b_slab, plan, dim_out, batch_tile=16)
    outputs = [jax.block_until_ready(o) for o in outputs]
    for i, o in enumerate(outputs):
        assert o.shape == (batch, dim_out[i]), o.shape

    # Loose-tolerance sanity check vs. plain-JAX f32 reference (bf16 MXU matmuls
    # introduce ~1e-3-level deviations).
    ref = _reference_forward(params, x, dim_hidden, task_num, ple_layers)
    for o, r in zip(outputs, ref):
        err = float(np.max(np.abs(np.asarray(o) - np.asarray(r))))
        assert np.allclose(np.asarray(o), np.asarray(r), atol=2e-2, rtol=0.0), err

    # TODO(synk): nn.Dropout layers are eval-mode identity (no RNG in this inference path).
    print("KERNEL_OK")
</pallas_src>

<mosaic_0001>
module attributes {stable_mosaic.version = 11 : i64} {
  func.func @_ple_kernel(%arg0: i32, %arg1: memref<16x16xbf16, #tpu.memory_space<vmem>>, %arg2: memref<1712x384xbf16, #tpu.memory_space<vmem>>, %arg3: memref<8x384xf32, #tpu.memory_space<vmem>>, %arg4: memref<16x128xf32, #tpu.memory_space<vmem>>) attributes {dimension_semantics = [#tpu.dimension_semantics<parallel>], iteration_bounds = array<i64: 2>, scalar_prefetch = 0 : i64, scratch_operands = 0 : i64, tpu.core_type = #tpu.core_type<tc>, window_params = [{transform_indices = @transform_0, window_bounds = array<i64: 16, 16>}, {pipeline_mode = #tpu.pipeline_mode<synchronous>, transform_indices = @transform_1, window_bounds = array<i64: 1712, 384>}, {pipeline_mode = #tpu.pipeline_mode<synchronous>, transform_indices = @transform_2, window_bounds = array<i64: 8, 384>}, {transform_indices = @transform_3, window_bounds = array<i64: 16, 128>}]} {
    %c0 = arith.constant 0 : index
    %c0_0 = arith.constant 0 : index
    %0 = vector.load %arg1[%c0, %c0_0] : memref<16x16xbf16, #tpu.memory_space<vmem>>, vector<16x16xbf16>
    %c0_1 = arith.constant 0 : index
    %c0_2 = arith.constant 0 : index
    %1 = vector.load %arg2[%c0_1, %c0_2] : memref<1712x384xbf16, #tpu.memory_space<vmem>>, vector<16x384xbf16>
    %cst = arith.constant dense<0.000000e+00> : vector<16x384xf32>
    %2 = tpu.matmul %0, %1, %cst {dimension_numbers = #tpu.dot_dimension_numbers<[1], [0], [0], [1], [0, 0, 1, 1], [], []>} : vector<16x16xbf16>, vector<16x384xbf16>, vector<16x384xf32> -> vector<16x384xf32>
    %c0_3 = arith.constant 0 : index
    %c0_4 = arith.constant 0 : index
    %3 = vector.load %arg3[%c0_3, %c0_4] : memref<8x384xf32, #tpu.memory_space<vmem>>, vector<1x384xf32>
    %4 = vector.broadcast %3 : vector<1x384xf32> to vector<16x384xf32>
    %5 = arith.addf %2, %4 : vector<16x384xf32>
    %6 = vector.extract_strided_slice %5 {offsets = [0, 256], sizes = [16, 16], strides = [1, 1]} : vector<16x384xf32> to vector<16x16xf32>
    %7 = vector.extract_strided_slice %5 {offsets = [0, 0], sizes = [16, 256], strides = [1, 1]} : vector<16x384xf32> to vector<16x256xf32>
    %cst_5 = arith.constant 0.000000e+00 : f32
    %8 = vector.broadcast %cst_5 : f32 to vector<16x256xf32>
    %9 = arith.maximumf %7, %8 : vector<16x256xf32>
    %c16 = arith.constant 16 : index
    %c0_6 = arith.constant 0 : index
    %10 = vector.load %arg2[%c16, %c0_6] : memref<1712x384xbf16, #tpu.memory_space<vmem>>, vector<256x256xbf16>
    %11 = arith.truncf %9 : vector<16x256xf32> to vector<16x256xbf16>
    %cst_7 = arith.constant dense<0.000000e+00> : vector<16x256xf32>
    %12 = tpu.matmul %11, %10, %cst_7 {dimension_numbers = #tpu.dot_dimension_numbers<[1], [0], [0], [1], [0, 0, 1, 1], [], []>} : vector<16x256xbf16>, vector<256x256xbf16>, vector<16x256xf32> -> vector<16x256xf32>
    %c1 = arith.constant 1 : index
    %c0_8 = arith.constant 0 : index
    %13 = vector.load %arg3[%c1, %c0_8] : memref<8x384xf32, #tpu.memory_space<vmem>>, vector<1x256xf32>
    %14 = vector.broadcast %13 : vector<1x256xf32> to vector<16x256xf32>
    %15 = arith.addf %12, %14 : vector<16x256xf32>
    %cst_9 = arith.constant 0.000000e+00 : f32
    %16 = vector.broadcast %cst_9 : f32 to vector<16x256xf32>
    %17 = arith.maximumf %15, %16 : vector<16x256xf32>
    %c272 = arith.constant 272 : index
    %c0_10 = arith.constant 0 : index
    %18 = vector.load %arg2[%c272, %c0_10] : memref<1712x384xbf16, #tpu.memory_space<vmem>>, vector<256x256xbf16>
    %19 = arith.truncf %17 : vector<16x256xf32> to vector<16x256xbf16>
    %cst_11 = arith.constant dense<0.000000e+00> : vector<16x256xf32>
    %20 = tpu.matmul %19, %18, %cst_11 {dimension_numbers = #tpu.dot_dimension_numbers<[1], [0], [0], [1], [0, 0, 1, 1], [], []>} : vector<16x256xbf16>, vector<256x256xbf16>, vector<16x256xf32> -> vector<16x256xf32>
    %c2 = arith.constant 2 : index
    %c0_12 = arith.constant 0 : index
    %21 = vector.load %arg3[%c2, %c0_12] : memref<8x384xf32, #tpu.memory_space<vmem>>, vector<1x256xf32>
    %22 = vector.broadcast %21 : vector<1x256xf32> to vector<16x256xf32>
    %23 = arith.addf %20, %22 : vector<16x256xf32>
    %cst_13 = arith.constant 0.000000e+00 : f32
    %24 = vector.broadcast %cst_13 : f32 to vector<16x256xf32>
    %25 = arith.maximumf %23, %24 : vector<16x256xf32>
    %cst_14 = arith.constant dense<0xFF800000> : vector<16xf32>
    %26 = vector.multi_reduction <maximumf>, %6, %cst_14 [1] : vector<16x16xf32> to vector<16xf32>
    %27 = vector.shape_cast %26 : vector<16xf32> to vector<16x1xf32>
    %28 = vector.broadcast %27 : vector<16x1xf32> to vector<16x16xf32>
    %29 = arith.subf %6, %28 : vector<16x16xf32>
    %30 = math.exp %29 : vector<16x16xf32>
    %c1168 = arith.constant 1168 : index
    %c0_15 = arith.constant 0 : index
    %31 = vector.load %arg2[%c1168, %c0_15] : memref<1712x384xbf16, #tpu.memory_space<vmem>>, vector<16x384xbf16>
    %32 = arith.truncf %30 : vector<16x16xf32> to vector<16x16xbf16>
    %cst_16 = arith.constant dense<0.000000e+00> : vector<16x384xf32>
    %33 = tpu.matmul %32, %31, %cst_16 {dimension_numbers = #tpu.dot_dimension_numbers<[1], [0], [0], [1], [0, 0, 1, 1], [], []>} : vector<16x16xbf16>, vector<16x384xbf16>, vector<16x384xf32> -> vector<16x384xf32>
    %34 = vector.extract_strided_slice %33 {offsets = [0, 0], sizes = [16, 256], strides = [1, 1]} : vector<16x384xf32> to vector<16x256xf32>
    %35 = vector.extract_strided_slice %33 {offsets = [0, 256], sizes = [16, 16], strides = [1, 1]} : vector<16x384xf32> to vector<16x16xf32>
    %36 = arith.mulf %25, %34 : vector<16x256xf32>
    %c1200 = arith.constant 1200 : index
    %c0_17 = arith.constant 0 : index
    %37 = vector.load %arg2[%c1200, %c0_17] : memref<1712x384xbf16, #tpu.memory_space<vmem>>, vector<256x128xbf16>
    %38 = arith.truncf %36 : vector<16x256xf32> to vector<16x256xbf16>
    %cst_18 = arith.constant dense<0.000000e+00> : vector<16x128xf32>
    %39 = tpu.matmul %38, %37, %cst_18 {dimension_numbers = #tpu.dot_dimension_numbers<[1], [0], [0], [1], [0, 0, 1, 1], [], []>} : vector<16x256xbf16>, vector<256x128xbf16>, vector<16x128xf32> -> vector<16x128xf32>
    %40 = tpu.reciprocal %35 : vector<16x16xf32> -> vector<16x16xf32>
    %c1184 = arith.constant 1184 : index
    %c0_19 = arith.constant 0 : index
    %41 = vector.load %arg2[%c1184, %c0_19] : memref<1712x384xbf16, #tpu.memory_space<vmem>>, vector<16x128xbf16>
    %42 = arith.truncf %40 : vector<16x16xf32> to vector<16x16xbf16>
    %cst_20 = arith.constant dense<0.000000e+00> : vector<16x128xf32>
    %43 = tpu.matmul %42, %41, %cst_20 {dimension_numbers = #tpu.dot_dimension_numbers<[1], [0], [0], [1], [0, 0, 1, 1], [], []>} : vector<16x16xbf16>, vector<16x128xbf16>, vector<16x128xf32> -> vector<16x128xf32>
    %44 = arith.mulf %39, %43 : vector<16x128xf32>
    %c528 = arith.constant 528 : index
    %c0_21 = arith.constant 0 : index
    %45 = vector.load %arg2[%c528, %c0_21] : memref<1712x384xbf16, #tpu.memory_space<vmem>>, vector<128x384xbf16>
    %46 = arith.truncf %44 : vector<16x128xf32> to vector<16x128xbf16>
    %cst_22 = arith.constant dense<0.000000e+00> : vector<16x384xf32>
    %47 = tpu.matmul %46, %45, %cst_22 {dimension_numbers = #tpu.dot_dimension_numbers<[1], [0], [0], [1], [0, 0, 1, 1], [], []>} : vector<16x128xbf16>, vector<128x384xbf16>, vector<16x384xf32> -> vector<16x384xf32>
    %c3 = arith.constant 3 : index
    %c0_23 = arith.constant 0 : index
    %48 = vector.load %arg3[%c3, %c0_23] : memref<8x384xf32, #tpu.memory_space<vmem>>, vector<1x384xf32>
    %49 = vector.broadcast %48 : vector<1x384xf32> to vector<16x384xf32>
    %50 = arith.addf %47, %49 : vector<16x384xf32>
    %51 = vector.extract_strided_slice %50 {offsets = [0, 256], sizes = [16, 16], strides = [1, 1]} : vector<16x384xf32> to vector<16x16xf32>
    %52 = vector.extract_strided_slice %50 {offsets = [0, 0], sizes = [16, 256], strides = [1, 1]} : vector<16x384xf32> to vector<16x256xf32>
    %cst_24 = arith.constant 0.000000e+00 : f32
    %53 = vector.broadcast %cst_24 : f32 to vector<16x256xf32>
    %54 = arith.maximumf %52, %53 : vector<16x256xf32>
    %c656 = arith.constant 656 : index
    %c0_25 = arith.constant 0 : index
    %55 = vector.load %arg2[%c656, %c0_25] : memref<1712x384xbf16, #tpu.memory_space<vmem>>, vector<256x256xbf16>
    %56 = arith.truncf %54 : vector<16x256xf32> to vector<16x256xbf16>
    %cst_26 = arith.constant dense<0.000000e+00> : vector<16x256xf32>
    %57 = tpu.matmul %56, %55, %cst_26 {dimension_numbers = #tpu.dot_dimension_numbers<[1], [0], [0], [1], [0, 0, 1, 1], [], []>} : vector<16x256xbf16>, vector<256x256xbf16>, vector<16x256xf32> -> vector<16x256xf32>
    %c4 = arith.constant 4 : index
    %c0_27 = arith.constant 0 : index
    %58 = vector.load %arg3[%c4, %c0_27] : memref<8x384xf32, #tpu.memory_space<vmem>>, vector<1x256xf32>
    %59 = vector.broadcast %58 : vector<1x256xf32> to vector<16x256xf32>
    %60 = arith.addf %57, %59 : vector<16x256xf32>
    %cst_28 = arith.constant 0.000000e+00 : f32
    %61 = vector.broadcast %cst_28 : f32 to vector<16x256xf32>
    %62 = arith.maximumf %60, %61 : vector<16x256xf32>
    %c912 = arith.constant 912 : index
    %c0_29 = arith.constant 0 : index
    %63 = vector.load %arg2[%c912, %c0_29] : memref<1712x384xbf16, #tpu.memory_space<vmem>>, vector<256x256xbf16>
    %64 = arith.truncf %62 : vector<16x256xf32> to vector<16x256xbf16>
    %cst_30 = arith.constant dense<0.000000e+00> : vector<16x256xf32>
    %65 = tpu.matmul %64, %63, %cst_30 {dimension_numbers = #tpu.dot_dimension_numbers<[1], [0], [0], [1], [0, 0, 1, 1], [], []>} : vector<16x256xbf16>, vector<256x256xbf16>, vector<16x256xf32> -> vector<16x256xf32>
    %c5 = arith.constant 5 : index
    %c0_31 = arith.constant 0 : index
    %66 = vector.load %arg3[%c5, %c0_31] : memref<8x384xf32, #tpu.memory_space<vmem>>, vector<1x256xf32>
    %67 = vector.broadcast %66 : vector<1x256xf32> to vector<16x256xf32>
    %68 = arith.addf %65, %67 : vector<16x256xf32>
    %cst_32 = arith.constant 0.000000e+00 : f32
    %69 = vector.broadcast %cst_32 : f32 to vector<16x256xf32>
    %70 = arith.maximumf %68, %69 : vector<16x256xf32>
    %cst_33 = arith.constant dense<0xFF800000> : vector<16xf32>
    %71 = vector.multi_reduction <maximumf>, %51, %cst_33 [1] : vector<16x16xf32> to vector<16xf32>
    %72 = vector.shape_cast %71 : vector<16xf32> to vector<16x1xf32>
    %73 = vector.broadcast %72 : vector<16x1xf32> to vector<16x16xf32>
    %74 = arith.subf %51, %73 : vector<16x16xf32>
    %75 = math.exp %74 : vector<16x16xf32>
    %c1168_34 = arith.constant 1168 : index
    %c0_35 = arith.constant 0 : index
    %76 = vector.load %arg2[%c1168_34, %c0_35] : memref<1712x384xbf16, #tpu.memory_space<vmem>>, vector<16x384xbf16>
    %77 = arith.truncf %75 : vector<16x16xf32> to vector<16x16xbf16>
    %cst_36 = arith.constant dense<0.000000e+00> : vector<16x384xf32>
    %78 = tpu.matmul %77, %76, %cst_36 {dimension_numbers = #tpu.dot_dimension_numbers<[1], [0], [0], [1], [0, 0, 1, 1], [], []>} : vector<16x16xbf16>, vector<16x384xbf16>, vector<16x384xf32> -> vector<16x384xf32>
    %79 = vector.extract_strided_slice %78 {offsets = [0, 0], sizes = [16, 256], strides = [1, 1]} : vector<16x384xf32> to vector<16x256xf32>
    %80 = vector.extract_strided_slice %78 {offsets = [0, 256], sizes = [16, 16], strides = [1, 1]} : vector<16x384xf32> to vector<16x16xf32>
    %81 = arith.mulf %70, %79 : vector<16x256xf32>
    %c1200_37 = arith.constant 1200 : index
    %c0_38 = arith.constant 0 : index
    %82 = vector.load %arg2[%c1200_37, %c0_38] : memref<1712x384xbf16, #tpu.memory_space<vmem>>, vector<256x128xbf16>
    %83 = arith.truncf %81 : vector<16x256xf32> to vector<16x256xbf16>
    %cst_39 = arith.constant dense<0.000000e+00> : vector<16x128xf32>
    %84 = tpu.matmul %83, %82, %cst_39 {dimension_numbers = #tpu.dot_dimension_numbers<[1], [0], [0], [1], [0, 0, 1, 1], [], []>} : vector<16x256xbf16>, vector<256x128xbf16>, vector<16x128xf32> -> vector<16x128xf32>
    %85 = tpu.reciprocal %80 : vector<16x16xf32> -> vector<16x16xf32>
    %c1184_40 = arith.constant 1184 : index
    %c0_41 = arith.constant 0 : index
    %86 = vector.load %arg2[%c1184_40, %c0_41] : memref<1712x384xbf16, #tpu.memory_space<vmem>>, vector<16x128xbf16>
    %87 = arith.truncf %85 : vector<16x16xf32> to vector<16x16xbf16>
    %cst_42 = arith.constant dense<0.000000e+00> : vector<16x128xf32>
    %88 = tpu.matmul %87, %86, %cst_42 {dimension_numbers = #tpu.dot_dimension_numbers<[1], [0], [0], [1], [0, 0, 1, 1], [], []>} : vector<16x16xbf16>, vector<16x128xbf16>, vector<16x128xf32> -> vector<16x128xf32>
    %89 = arith.mulf %84, %88 : vector<16x128xf32>
    %c1456 = arith.constant 1456 : index
    %c0_43 = arith.constant 0 : index
    %90 = vector.load %arg2[%c1456, %c0_43] : memref<1712x384xbf16, #tpu.memory_space<vmem>>, vector<128x128xbf16>
    %91 = arith.truncf %89 : vector<16x128xf32> to vector<16x128xbf16>
    %cst_44 = arith.constant dense<0.000000e+00> : vector<16x128xf32>
    %92 = tpu.matmul %91, %90, %cst_44 {dimension_numbers = #tpu.dot_dimension_numbers<[1], [0], [0], [1], [0, 0, 1, 1], [], []>} : vector<16x128xbf16>, vector<128x128xbf16>, vector<16x128xf32> -> vector<16x128xf32>
    %c6 = arith.constant 6 : index
    %c0_45 = arith.constant 0 : index
    %93 = vector.load %arg3[%c6, %c0_45] : memref<8x384xf32, #tpu.memory_space<vmem>>, vector<1x128xf32>
    %94 = vector.broadcast %93 : vector<1x128xf32> to vector<16x128xf32>
    %95 = arith.addf %92, %94 : vector<16x128xf32>
    %cst_46 = arith.constant 0.000000e+00 : f32
    %96 = vector.broadcast %cst_46 : f32 to vector<16x128xf32>
    %97 = arith.maximumf %95, %96 : vector<16x128xf32>
    %c1584 = arith.constant 1584 : index
    %c0_47 = arith.constant 0 : index
    %98 = vector.load %arg2[%c1584, %c0_47] : memref<1712x384xbf16, #tpu.memory_space<vmem>>, vector<128x128xbf16>
    %99 = arith.truncf %97 : vector<16x128xf32> to vector<16x128xbf16>
    %cst_48 = arith.constant dense<0.000000e+00> : vector<16x128xf32>
    %100 = tpu.matmul %99, %98, %cst_48 {dimension_numbers = #tpu.dot_dimension_numbers<[1], [0], [0], [1], [0, 0, 1, 1], [], []>} : vector<16x128xbf16>, vector<128x128xbf16>, vector<16x128xf32> -> vector<16x128xf32>
    %c7 = arith.constant 7 : index
    %c0_49 = arith.constant 0 : index
    %101 = vector.load %arg3[%c7, %c0_49] : memref<8x384xf32, #tpu.memory_space<vmem>>, vector<1x128xf32>
    %102 = vector.broadcast %101 : vector<1x128xf32> to vector<16x128xf32>
    %103 = arith.addf %100, %102 : vector<16x128xf32>
    %c0_50 = arith.constant 0 : index
    %c0_51 = arith.constant 0 : index
    %104 = vector.load %arg4[%c0_50, %c0_51] : memref<16x128xf32, #tpu.memory_space<vmem>>, vector<16x128xf32>
    tpu.vector_store %arg4[%c0_50, %c0_51], %103 {strides = array<i32>} : memref<16x128xf32, #tpu.memory_space<vmem>>, vector<16x128xf32>,
    return
  }
  func.func @transform_0(%arg0: i32) -> (i32, i32) {
    %c0_i32 = arith.constant 0 : i32
    %c0_i32_0 = arith.constant 0 : i32
    return %arg0, %c0_i32 : i32, i32
  }
  func.func @transform_1(%arg0: i32) -> (i32, i32) {
    %c0_i32 = arith.constant 0 : i32
    %c0_i32_0 = arith.constant 0 : i32
    %c0_i32_1 = arith.constant 0 : i32
    return %c0_i32, %c0_i32_0 : i32, i32
  }
  func.func @transform_2(%arg0: i32) -> (i32, i32) {
    %c0_i32 = arith.constant 0 : i32
    %c0_i32_0 = arith.constant 0 : i32
    %c0_i32_1 = arith.constant 0 : i32
    return %c0_i32, %c0_i32_0 : i32, i32
  }
  func.func @transform_3(%arg0: i32) -> (i32, i32) {
    %c0_i32 = arith.constant 0 : i32
    %c0_i32_0 = arith.constant 0 : i32
    return %arg0, %c0_i32 : i32, i32
  }
}

</mosaic_0001>

<bundles_post_ra>
// kernel: tpu_custom_call.1
= control target key start
LH: loop header
LB: loop body
LE: loop exit
PB: predicated region body
PF: predicated region fallthrough
CT: control target
= control target key end

     0   :  { %8 = vsyncpa [#allocation3], 0  ;;  %s3735_s0 = inlined_call_operand.vmem [shape: bf16[32,16], index: 0, kind: input, shape index: {}]   ;;  %s3736_s1 = inlined_call_operand.hbm [shape: bf16[1712,384], index: 1, kind: input, shape index: {}]   ;;  %s3737_s2 = inlined_call_operand.hbm [shape: f32[8,384], index: 2, kind: input, shape index: {}]   ;;  %s3738_s3 = inlined_call_operand.hbm [shape: f32[32,128], index: 3, kind: output, shape index: {}]  }
   0x1   :  { %9 = vsyncpa [#allocation6], 0 }
   0x2   :  { %10 = vsyncpa [#allocation4], 0 }
   0x3   :  { %12 = vsyncpa [#allocation4 + $0x1], 0  ;;  %s3379_s12 = smov 0   ;;  %s3381_s13 = smov 0  }
   0x4   :  { %s3383_s14 = smov 0   ;;  %s3385_s15 = smov 0  }
   0x5 LB: > { %s3400_s16 = sadd.s32 4294967295, %s3347_s15   ;;  %s2484_s17 = sadd.s32 4294967294, %s3347_s15   ;;  %s3347_s15 = sphi %s3385_s15, %s3756_s15   ;;  %s3343_s14 = sphi %s3383_s14, %s3755_s14   ;;  %s3339_s13 = sphi %s3381_s13, %s3754_s13   ;;  %s3335_s12 = sphi %s3379_s12, %s3753_s12  }
   0x6   : > { %s3404_s18 = sadd.s32 1, %s3347_s15   ;;  %s93_s19 = sadd.s32 1, %s3343_s14 }
   0x7   : > { %s90_s20 = ssub.s32 %s3347_s15, %s3404_s18  ;;  %p103_p0 = scmp.ne.s32.totalorder %s3343_s14, %s3339_s13 }
   0x8   : > { %p91_p1 = scmp.eq.s32.totalorder %s90_s20, 0  ;;  %p104_p2 = scmp.eq.s32.totalorder %s3400_s16, 1 }
   0x9   : > { %p109_p3 = scmp.ne.s32.totalorder %s3339_s13, %s3335_s12  ;;  %p110_p4 = scmp.eq.s32.totalorder %s2484_s17, 1 }
   0xa   : > { %s3415_s21 = scalar_select %p91_p1, %s3343_s14, %s93_s19  }
   0xb   : > { %p3417_p5 = por %p104_p2, %p103_p0  ;;  %p3421_p6 = por %p110_p4, %p109_p3 }
   0xc   : > { %p2485_p7 = scmp.ge.s32.totalorder %s3347_s15, 1  ;;  %p117_p8 = scmp.lt.s32.totalorder %s3347_s15, 3 }
   0xd   : > { %s3742_s22 = scalar_select %p3417_p5, 1, 0 }
   0xe   : > { %s3743_s23 = scalar_select %p3421_p6, 1, 0 }
   0xf   : > { %p3739_p9 = scmp.eq.s32.totalorder %s3400_s16, 0  ;;  %p3428_p10 = pnand %p2485_p7, %p117_p8 }
  0x10   : > { %s3349_s25 = smov [#allocation2]   ;;  %s3350_s28 = smov [#allocation5]  }
  0x11   : > { %s3744_s24 = scalar_select %p3428_p10, 1, 0 }
  0x12   : > { %s129_s26 = sshll.u32 %s3349_s25, 4  ;;  %p2882_p11 = pneg %p3428_p10  ;;  %s130_s26 = int_to_ptr.vmem [resolvable:$true] %s129_s26 }
  0x13   : > { %s143_s29 = sshll.u32 %s3350_s28, 4  ;;  %s3221_s5 = scalar_lea.hbm %s3736_s1, 41088  ;;  %s3440_s29 = int_to_ptr.vmem [resolvable:$true] %s143_s29 }
  0x14   : > { %p3436_p12 = pnand %p3739_p9, %p2882_p11  ;;  %p3222_p13 = scmp.ne.s32.totalorder %s3736_s1, %s3221_s5 }
  0x15   : > { %p3228_p3 = scmp.lt.u32.totalorder %s3221_s5, %s3736_s1 }
  0x16   : > { %p3223_p0 = pneg %p3436_p12 }
  0x18   : > { %p3224_p1 = pnand %p3223_p0, %p3222_p13 }
  0x1a   : > { %p3225_p2 = pneg %p3224_p1 }
  0x1c   : > { %p3230_p4 = pnand %p3228_p3, %p3225_p2 }
  0x1e   : > { %3233 = shalt.err (!%p3230_p4)
}
  0x1f   : > { %s3234_s10 = scalar_lea.vmem %s130_s26, 41088  ;;  %p3242_p9 = scmp.lt.s32.totalorder %s130_s26, %s130_s26 }
  0x20   : > { %p3235_p7 = scmp.ne.s32.totalorder %s130_s26, %s3234_s10  ;;  %p3243_p6 = scmp.lt.s32.totalorder %s3234_s10, %s3234_s10 }
  0x22   : > { %p3237_p8 = pnand %p3235_p7, %p3223_p0  ;;  %p3244_p5 = por %p3243_p6, %p3242_p9 }
  0x24   : > { %p3238_p11 = pneg %p3237_p8 }
  0x26   : > { %p3245_p10 = pnand %p3244_p5, %p3238_p11 }
  0x28   : > { %3248 = shalt.err (!%p3245_p10)
}
  0x29   : > { %s3351_s11 = smov 192   ;;  %s3352_s17 = smov 12  }
  0x2a   : > { %2885 = dma.hbm_to_vmem [thread:$0]  (!%p3436_p12), %s3736_s1, 41088, %s130_s26, [#allocation3], %s3351_s11, %s3351_s11, %s3352_s17  }
  0x2b   : > { %s3249_s30 = scalar_lea.hbm %s3737_s2, 384 }
  0x2c   : > { %p3250_p13 = scmp.ne.s32.totalorder %s3737_s2, %s3249_s30  ;;  %p3256_p9 = scmp.lt.u32.totalorder %s3249_s30, %s3737_s2 }
  0x2e   : > { %p3252_p5 = pnand %p3250_p13, %p3223_p0 }
  0x30   : > { %p3253_p6 = pneg %p3252_p5 }
  0x32   : > { %p3258_p10 = pnand %p3256_p9, %p3253_p6 }
  0x34   : > { %3261 = shalt.err (!%p3258_p10)
}
  0x35   : > { %s3262_s26 = scalar_lea.vmem %s3440_s29, 384  ;;  %p3270_p4 = scmp.lt.s32.totalorder %s3440_s29, %s3440_s29 }
  0x36   : > { %p3263_p1 = scmp.ne.s32.totalorder %s3440_s29, %s3262_s26  ;;  %p3271_p7 = scmp.lt.s32.totalorder %s3262_s26, %s3262_s26 }
  0x38   : > { %p3265_p2 = pnand %p3263_p1, %p3223_p0  ;;  %p3272_p8 = por %p3271_p7, %p3270_p4 }
  0x3a   : > { %p3266_p3 = pneg %p3265_p2 }
  0x3c   : > { %p3273_p11 = pnand %p3272_p8, %p3266_p3 }
  0x3e   : > { %3276 = shalt.err (!%p3273_p11)
}
  0x3f   : > { %2888 = dma.hbm_to_vmem [thread:$0]  (!%p3436_p12), %s3737_s2, 384, %s3440_s29, [#allocation6]  }
  0x40   : > { %p3746_p13 = scmp.ne.s32.totalorder %s3744_s24, 0 }
  0x41   : > { %p3747_p5 = scmp.eq.s32.totalorder (!%p3746_p13), %s3400_s16, 0 }
  0x42   : > { %165 = sbr.rel (%p3746_p13) target bundleno = 2314 (0x90a), region = 32 }
  0x49   : > { %3322 = dma.done.wait (%p3747_p5), [#allocation3], 41088   ;;  %p3748_p0 = pmov %p3747_p5 }
  0x4b   : > { %3324 = vsyncadd (%p3748_p0), [#allocation3], 4294926208  ;;  %p3749_p6 = pmov %p3748_p0 }
  0x4c   : > { %p3750_p9 = pmov %p3748_p0 }
  0x4d   : > { %3326 = dma.done.wait (%p3749_p6), [#allocation6], 384  }
  0x4e   : > { %3328 = vsyncadd (%p3750_p9), [#allocation6], 4294966912  ;;  %s2493_s27 = sshll.u32 %s3400_s16, 1  ;;  %v3353_v0 = vmov 0.0   ;;  %vm3354_vm0 = vmmov 0   ;;  %v3355_v1 = vmov 0   ;;  %v209_v38 = vlaneseq }
  0x4f   : > { %2782 = vmatprep.subr.bf16.mxu1 %v3353_v0  ;;  %2784 = vmatprep.mubr.msk.bf16.mxu1 %vm3354_vm0, %v3353_v0  ;;  %p194_p12 = scmp.lt.s32.totalorder %s2493_s27, 3  ;;  %v2939_v2 = vld [vmem:[#allocation2 + $0x4] ss:$12 sps:$4 sm:$0xff]   ;;  %v2941_v3 = vld [vmem:[#allocation2 + $0x8] ss:$12 sps:$4 sm:$0xff]   ;;  %vm245_vm1 = vcmask 130048  }
  0x50   : > { %281 = vmatprep.mubr.bf16.mxu0 %v3355_v1  ;;  %249 = vmatprep.subr.bf16.mxu0 %v2939_v2  ;;  %v2942_v4 = vld [vmem:[#allocation2] ss:$12 sps:$4 sm:$0xff]   ;;  %v2944_v6 = vld [vmem:[#allocation2 + $0x18] ss:$12 sps:$4 sm:$0xff]   ;;  %v2946_v7 = vld [vmem:[#allocation2 + $0x1c] ss:$12 sps:$4 sm:$0xff]  }
  0x51   : > { %s3758_s27 = smov (!%p194_p12, %s2493_s27), 3  ;;  %2783 = vmatpush3.bf16.msra.mxu1 %v2941_v3  ;;  %250 = vmatpush1.bf16.msra.mxu0 %v2942_v4  ;;  %v2949_v8 = vld [vmem:[#allocation2 + $0x34] ss:$12 sps:$4 sm:$0xff]   ;;  %v2947_v9 = vld [vmem:[#allocation2 + $0x30] ss:$12 sps:$4 sm:$0xff]   ;;  %v3509_v39 = vshrl.u32 %v209_v38, 7 }
  0x52   : > { %s2494_s24 = sshll.u32 %s3758_s27, 2  ;;  %544 = vmatprep.subr.bf16.mxu0 %v2946_v7  ;;  %v2952_v10 = vld [vmem:[#allocation2 + $0x4c] ss:$12 sps:$4 sm:$0xff]   ;;  %v2950_v11 = vld [vmem:[#allocation2 + $0x48] ss:$12 sps:$4 sm:$0xff]   ;;  %s190_s17 = sand.u32 1, %s3339_s13  }
  0x53   : > { %s197_s11 = scalar_lea.vmem %s3735_s0, %s2494_s24  ;;  %v2955_v12 = vld [vmem:[#allocation2 + $0x64] ss:$12 sps:$4 sm:$0xff]   ;;  %v2953_v13 = vld [vmem:[#allocation2 + $0x60] ss:$12 sps:$4 sm:$0xff]   ;;  %v2958_v14 = vld [vmem:[#allocation2 + $0x7c] ss:$12 sps:$4 sm:$0xff]  }
  0x54   : > { %v2943_v5 = vld [vmem:[%s197_s11] sm:$0xff]   ;;  %v2956_v15 = vld [vmem:[#allocation2 + $0x78] ss:$12 sps:$4 sm:$0xff]   ;;  %v2965_v21 = vld [vmem:[#allocation2 + $0xc0] ss:$12 sps:$4 sm:$0xff]   ;;  %v219_v40 = vsub.s32 2, %v3509_v39 }
  0x55   : > { %2785 = vmatmul.mubr.msk.bf16.vlgmr.msra.gmra.mrb[0].mxu1 %vm245_vm1, %v2943_v5  ;;  %2499 = vmatmul.mubr.msk.bf16.vlgmr.msra.gmra.mrb[0].mxu0 %vm245_vm1, %v2943_v5  ;;  %v2961_v16 = vld [vmem:[#allocation2 + $0x94] ss:$12 sps:$4 sm:$0xff]   ;;  %v2959_v17 = vld [vmem:[#allocation2 + $0x90] ss:$12 sps:$4 sm:$0xff]   ;;  %v2964_v18 = vld [vmem:[#allocation2 + $0xac] ss:$12 sps:$4 sm:$0xff]  }
  0x56   : > { %545 = vmatpush1.bf16.msra.mxu0 %v2944_v6  ;;  %v2962_v19 = vld [vmem:[#allocation2 + $0xa8] ss:$12 sps:$4 sm:$0xff]   ;;  %v2967_v20 = vld [vmem:[#allocation2 + $0xc4] ss:$12 sps:$4 sm:$0xff]   ;;  %v2976_v26 = vld [vmem:[#allocation2 + $0x10c] ss:$12 sps:$4 sm:$0xff]  }
  0x57   : > { %546 = vmatprep.subr.bf16.mxu0 %v2949_v8  ;;  %v2970_v22 = vld [vmem:[#allocation2 + $0xdc] ss:$12 sps:$4 sm:$0xff]   ;;  %v2968_v23 = vld [vmem:[#allocation2 + $0xd8] ss:$12 sps:$4 sm:$0xff]   ;;  %v2973_v24 = vld [vmem:[#allocation2 + $0xf4] ss:$12 sps:$4 sm:$0xff]  }
  0x58   : > { %v2971_v25 = vld [vmem:[#allocation2 + $0xf0] ss:$12 sps:$4 sm:$0xff]   ;;  %v2974_v27 = vld [vmem:[#allocation2 + $0x108] ss:$12 sps:$4 sm:$0xff]   ;;  %v2977_v29 = vld [vmem:[#allocation2 + $0x120] ss:$12 sps:$4 sm:$0xff]  }
  0x59   : > { %v2979_v28 = vld [vmem:[#allocation2 + $0x124] ss:$12 sps:$4 sm:$0xff]   ;;  %v2982_v30 = vld [vmem:[#allocation2 + $0x13c] ss:$12 sps:$4 sm:$0xff]   ;;  %v2985_v32 = vld [vmem:[#allocation2 + $0x154] ss:$12 sps:$4 sm:$0xff]  }
  0x5a   : > { %547 = vmatpush1.bf16.msra.mxu0 %v2947_v9  ;;  %v2980_v31 = vld [vmem:[#allocation2 + $0x138] ss:$12 sps:$4 sm:$0xff]   ;;  %v2983_v33 = vld [vmem:[#allocation2 + $0x150] ss:$12 sps:$4 sm:$0xff]   ;;  %v2986_v35 = vld [vmem:[#allocation2 + $0x168] ss:$12 sps:$4 sm:$0xff]  }
  0x5b   : > { %548 = vmatprep.subr.bf16.mxu0 %v2952_v10  ;;  %v2988_v34 = vld [vmem:[#allocation2 + $0x16c] ss:$12 sps:$4 sm:$0xff]   ;;  %v2991_v36 = vld [vmem:[#allocation2 + $0x184] ss:$12 sps:$4 sm:$0xff]   ;;  %v3513_v42 = vsub.s32 0, %v3509_v39  ;;  %v3516_v43 = vsub.s32 1, %v3509_v39 }
  0x5c   : > { %v2989_v37 = vld [vmem:[#allocation2 + $0x180] ss:$12 sps:$4 sm:$0xff]   ;;  %v207_v41 = vld [vmem:[#allocation5] ss:$8 sm:$0x7]  ;;  %s2492_s19 = sshll.u32 %s190_s17, 4 }
  0x5d   : > { %v220_v44 = vrot.slane %v207_v41, %v219_v40  ;;  %v212_v45 = vrot.slane %v207_v41, %v3513_v42  ;;  %v216_v46 = vrot.slane %v207_v41, %v3516_v43  ;;  %v3531_v7 = vld [vmem:[#allocation2 + $0x6d8] ss:$12 sps:$4 sm:$0xff]   ;;  %v3533_v8 = vld [vmem:[#allocation2 + $0x6dc] ss:$12 sps:$4 sm:$0xff]   ;;  %s192_s20 = scalar_lea.vmem [#allocation7], %s2492_s19  ;;  %s2700_s28 = sshll.u32 %s3400_s16, 8 }
  0x5e   : > { %549 = vmatpush1.bf16.msra.mxu0 %v2950_v11  ;;  %v2995_v9 = vld [vmem:[#allocation2 + $0x198] ss:$12 sps:$4 sm:$0xff]   ;;  %v2997_v10 = vld [vmem:[#allocation2 + $0x19c] ss:$12 sps:$4 sm:$0xff]   ;;  %v3001_v11 = vld [vmem:[#allocation2 + $0x1b4] ss:$12 sps:$4 sm:$0xff]   ;;  %s3692_s5 = scalar_lea.hbm %s3738_s3, %s2700_s28 }
  0x5f   : > { %550 = vmatprep.subr.bf16.mxu0 %v2955_v12  ;;  %798 = vmatprep.subr.bf16.mxu1 %v2997_v10  ;;  %v2999_v12 = vld [vmem:[#allocation2 + $0x1b0] ss:$12 sps:$4 sm:$0xff]   ;;  %v3038_v38 = vld [vmem:[#allocation2 + $0x2e8] ss:$12 sps:$4 sm:$0xff]   ;;  %s2400_s25 = sshll.u32 %s192_s20, 4  ;;  %s3694_s6 = scalar_lea.sflag [#allocation4], %s190_s17  ;;  %s3687_s25 = int_to_ptr.vmem [resolvable:$true] %s2400_s25 }
  0x60   : > { %799 = vmatpush1.bf16.msra.mxu1 %v2995_v9  ;;  %v3043_v41 = vld [vmem:[#allocation2 + $0x304] ss:$12 sps:$4 sm:$0xff]   ;;  %s3277_s16 = scalar_lea.vmem %s3687_s25, 256  ;;  %p3751_p1 = scmp.ne.s32.totalorder %s3742_s22, 0 }
  0x61   : > { %800 = vmatprep.subr.bf16.mxu1 %v3001_v11  ;;  %p3278_p10 = scmp.ne.s32.totalorder %s3687_s25, %s3277_s16  ;;  %s3356_s7 = smov [#allocation7]  }
  0x62   : > { %551 = vmatpush1.bf16.msra.mxu0 %v2953_v13  ;;  %v3002_v13 = vld [vmem:[#allocation2 + $0x1c8] ss:$12 sps:$4 sm:$0xff]   ;;  %s3281_s26 = sshll.u32 %s3356_s7, 4  ;;  %s3282_s26 = int_to_ptr.vmem [resolvable:$false] %s3281_s26 }
  0x63   : > { %552 = vmatprep.subr.bf16.mxu0 %v2958_v14  ;;  %v3004_v14 = vld [vmem:[#allocation2 + $0x1cc] ss:$12 sps:$4 sm:$0xff]   ;;  %p3279_p2 = pnand %p3278_p10, %p3751_p1  ;;  %s3283_s8 = scalar_lea.vmem %s3282_s26, 512 }
  0x64   : > { %801 = vmatpush1.bf16.msra.mxu1 %v2999_v12  ;;  %v3552_v12 = vld [vmem:[#allocation2 + $0x6f0] ss:$12 sps:$4 sm:$0xff]   ;;  %p3284_p4 = scmp.lt.s32.totalorder %s3687_s25, %s3282_s26  ;;  %p3285_p7 = scmp.lt.s32.totalorder %s3283_s8, %s3277_s16 }
  0x65   : > { %802 = vmatprep.subr.bf16.mxu1 %v3004_v14  ;;  %v3557_v14 = vld [vmem:[#allocation2 + $0x708] ss:$12 sps:$4 sm:$0xff]   ;;  %p3280_p3 = pneg %p3279_p2 }
  0x66   : > { %553 = vmatpush1.bf16.msra.mxu0 %v2956_v15  ;;  %v3007_v15 = vld [vmem:[#allocation2 + $0x1e4] ss:$12 sps:$4 sm:$0xff]   ;;  %p3286_p8 = por %p3285_p7, %p3284_p4 }
  0x67   : > { %554 = vmatprep.subr.bf16.mxu0 %v2961_v16  ;;  %v3005_v16 = vld [vmem:[#allocation2 + $0x1e0] ss:$12 sps:$4 sm:$0xff]  }
  0x68   : > { %803 = vmatpush1.bf16.msra.mxu1 %v3002_v13  ;;  %v3555_v13 = vld [vmem:[#allocation2 + $0x7c8] ss:$12 sps:$4 sm:$0xff]   ;;  %p3287_p11 = pnand %p3286_p8, %p3280_p3 }
  0x69   : > { %804 = vmatprep.subr.bf16.mxu1 %v3007_v15  ;;  %v3559_v15 = vld [vmem:[#allocation2 + $0x7e0] ss:$12 sps:$4 sm:$0xff]  }
  0x6a   : > { %555 = vmatpush1.bf16.msra.mxu0 %v2959_v17  ;;  %v3010_v17 = vld [vmem:[#allocation2 + $0x1fc] ss:$12 sps:$4 sm:$0xff]  }
  0x6b   : > { %556 = vmatprep.subr.bf16.mxu0 %v2964_v18  ;;  %v3008_v18 = vld [vmem:[#allocation2 + $0x1f8] ss:$12 sps:$4 sm:$0xff]  }
  0x6c   : > { %805 = vmatpush1.bf16.msra.mxu1 %v3005_v16  ;;  %v3563_v16 = vld [vmem:[#allocation2 + $0x720] ss:$12 sps:$4 sm:$0xff]  }
  0x6d   : > { %806 = vmatprep.subr.bf16.mxu1 %v3010_v17  ;;  %v3566_v17 = vld [vmem:[#allocation2 + $0x7f8] ss:$12 sps:$4 sm:$0xff]  }
  0x6e   : > { %557 = vmatpush1.bf16.msra.mxu0 %v2962_v19  ;;  %v3013_v19 = vld [vmem:[#allocation2 + $0x214] ss:$12 sps:$4 sm:$0xff]  }
  0x6f   : > { %558 = vmatprep.subr.bf16.mxu0 %v2967_v20  ;;  %v3011_v20 = vld [vmem:[#allocation2 + $0x210] ss:$12 sps:$4 sm:$0xff]  }
  0x70   : > { %807 = vmatpush1.bf16.msra.mxu1 %v3008_v18  ;;  %v3569_v18 = vld [vmem:[#allocation2 + $0x738] ss:$12 sps:$4 sm:$0xff]  }
  0x71   : > { %808 = vmatprep.subr.bf16.mxu1 %v3013_v19  ;;  %v3572_v19 = vld [vmem:[#allocation2 + $0x810] ss:$12 sps:$4 sm:$0xff]  }
  0x72   : > { %559 = vmatpush1.bf16.msra.mxu0 %v2965_v21  ;;  %v3016_v21 = vld [vmem:[#allocation2 + $0x22c] ss:$12 sps:$4 sm:$0xff]  }
  0x73   : > { %560 = vmatprep.subr.bf16.mxu0 %v2970_v22  ;;  %v3014_v22 = vld [vmem:[#allocation2 + $0x228] ss:$12 sps:$4 sm:$0xff]  }
  0x74   : > { %809 = vmatpush1.bf16.msra.mxu1 %v3011_v20  ;;  %v3575_v20 = vld [vmem:[#allocation2 + $0x750] ss:$12 sps:$4 sm:$0xff]  }
  0x75   : > { %810 = vmatprep.subr.bf16.mxu1 %v3016_v21  ;;  %v3578_v21 = vld [vmem:[#allocation2 + $0x828] ss:$12 sps:$4 sm:$0xff]  }
  0x76   : > { %561 = vmatpush1.bf16.msra.mxu0 %v2968_v23  ;;  %v3019_v23 = vld [vmem:[#allocation2 + $0x244] ss:$12 sps:$4 sm:$0xff]  }
  0x77   : > { %562 = vmatprep.subr.bf16.mxu0 %v2973_v24  ;;  %v3017_v24 = vld [vmem:[#allocation2 + $0x240] ss:$12 sps:$4 sm:$0xff]  }
  0x78   : > { %811 = vmatpush1.bf16.msra.mxu1 %v3014_v22  ;;  %v3581_v22 = vld [vmem:[#allocation2 + $0x768] ss:$12 sps:$4 sm:$0xff]  }
  0x79   : > { %812 = vmatprep.subr.bf16.mxu1 %v3019_v23  ;;  %v3585_v23 = vld [vmem:[#allocation2 + $0x840] ss:$12 sps:$4 sm:$0xff]  }
  0x7a   : > { %563 = vmatpush1.bf16.msra.mxu0 %v2971_v25  ;;  %v3022_v25 = vld [vmem:[#allocation2 + $0x25c] ss:$12 sps:$4 sm:$0xff]  }
  0x7b   : > { %564 = vmatprep.subr.bf16.mxu0 %v2976_v26  ;;  %v3020_v26 = vld [vmem:[#allocation2 + $0x258] ss:$12 sps:$4 sm:$0xff]  }
  0x7c   : > { %813 = vmatpush1.bf16.msra.mxu1 %v3017_v24  ;;  %v3587_v24 = vld [vmem:[#allocation2 + $0x780] ss:$12 sps:$4 sm:$0xff]  }
  0x7d   : > { %814 = vmatprep.subr.bf16.mxu1 %v3022_v25  ;;  %v3591_v25 = vld [vmem:[#allocation2 + $0x858] ss:$12 sps:$4 sm:$0xff]  }
  0x7e   : > { %565 = vmatpush1.bf16.msra.mxu0 %v2974_v27  ;;  %v3025_v27 = vld [vmem:[#allocation2 + $0x274] ss:$12 sps:$4 sm:$0xff]  }
  0x7f   : > { %566 = vmatprep.subr.bf16.mxu0 %v2979_v28  ;;  %v3023_v28 = vld [vmem:[#allocation2 + $0x270] ss:$12 sps:$4 sm:$0xff]  }
  0x80   : > { %815 = vmatpush1.bf16.msra.mxu1 %v3020_v26  ;;  %v3593_v26 = vld [vmem:[#allocation2 + $0x798] ss:$12 sps:$4 sm:$0xff]  }
  0x81   : > { %816 = vmatprep.subr.bf16.mxu1 %v3025_v27  ;;  %v3597_v27 = vld [vmem:[#allocation2 + $0x870] ss:$12 sps:$4 sm:$0xff]  }
  0x82   : > { %567 = vmatpush1.bf16.msra.mxu0 %v2977_v29  ;;  %v3028_v29 = vld [vmem:[#allocation2 + $0x28c] ss:$12 sps:$4 sm:$0xff]  }
  0x83   : > { %568 = vmatprep.subr.bf16.mxu0 %v2982_v30  ;;  %v3026_v30 = vld [vmem:[#allocation2 + $0x288] ss:$12 sps:$4 sm:$0xff]  }
  0x84   : > { %817 = vmatpush1.bf16.msra.mxu1 %v3023_v28  ;;  %v3599_v28 = vld [vmem:[#allocation2 + $0x7b0] ss:$12 sps:$4 sm:$0xff]  }
  0x85   : > { %818 = vmatprep.subr.bf16.mxu1 %v3028_v29 }
  0x86   : > { %569 = vmatpush1.bf16.msra.mxu0 %v2980_v31  ;;  %v3031_v31 = vld [vmem:[#allocation2 + $0x2a4] ss:$12 sps:$4 sm:$0xff]  }
  0x87   : > { %570 = vmatprep.subr.bf16.mxu0 %v2985_v32  ;;  %v3029_v32 = vld [vmem:[#allocation2 + $0x2a0] ss:$12 sps:$4 sm:$0xff]  }
  0x88   : > { %819 = vmatpush1.bf16.msra.mxu1 %v3026_v30 }
  0x89   : > { %820 = vmatprep.subr.bf16.mxu1 %v3031_v31 }
  0x8a   : > { %571 = vmatpush1.bf16.msra.mxu0 %v2983_v33  ;;  %v3034_v33 = vld [vmem:[#allocation2 + $0x2bc] ss:$12 sps:$4 sm:$0xff]  }
  0x8b   : > { %572 = vmatprep.subr.bf16.mxu0 %v2988_v34  ;;  %v3032_v34 = vld [vmem:[#allocation2 + $0x2b8] ss:$12 sps:$4 sm:$0xff]  }
  0x8c   : > { %821 = vmatpush1.bf16.msra.mxu1 %v3029_v32 }
  0x8d   : > { %822 = vmatprep.subr.bf16.mxu1 %v3034_v33 }
  0x8e   : > { %573 = vmatpush1.bf16.msra.mxu0 %v2986_v35  ;;  %v3037_v35 = vld [vmem:[#allocation2 + $0x2d4] ss:$12 sps:$4 sm:$0xff]  }
  0x8f   : > { %574 = vmatprep.subr.bf16.mxu0 %v2991_v36  ;;  %v3035_v36 = vld [vmem:[#allocation2 + $0x2d0] ss:$12 sps:$4 sm:$0xff]  }
  0x90   : > { %823 = vmatpush1.bf16.msra.mxu1 %v3032_v34 }
  0x91   : > { %824 = vmatprep.subr.bf16.mxu1 %v3037_v35 }
  0x92   : > { %575 = vmatpush1.bf16.msra.mxu0 %v2989_v37  ;;  %v3040_v37 = vld [vmem:[#allocation2 + $0x2ec] ss:$12 sps:$4 sm:$0xff]  }
  0x93   : > { %881 = vmatprep.subr.bf16.mxu0 %v3533_v8 }
  0x94   : > { %825 = vmatpush1.bf16.msra.mxu1 %v3035_v36 }
  0x95   : > { %826 = vmatprep.subr.bf16.mxu1 %v3040_v37 }
  0x98   : > { %827 = vmatpush1.bf16.msra.mxu1 %v3038_v38 }
  0x99   : > { %828 = vmatprep.subr.bf16.mxu1 %v3043_v41 }
 0x128   : > { %v326_v47 = vpop.f32.mrb[0].mxu1  ;;  %v283_v49 = vpop.f32.mrb[0].mxu0 }
 0x129   : > { %v3522_v48 = vadd.f32 %v326_v47, %v220_v44  ;;  %v2786_v50 = vpop.f32.mrb[1].mxu1  ;;  %v284_v51 = vadd.f32 %v283_v49, %v212_v45  ;;  %v285_v52 = vpop.f32.mrb[1].mxu0 }
 0x12a   : > { %v329_v53 = vpop.f32.mrb[2].mxu1  ;;  %v286_v54 = vadd.f32 %v285_v52, %v216_v46  ;;  %v287_v55 = vpop.f32.mrb[2].mxu0 }
 0x12b   : > { %v845_v56 = vsel %vm245_vm1, %v3522_v48, -inf  ;;  %v3526_v57 = vadd.f32 %v329_v53, %v220_v44  ;;  %v2787_v58 = vpop.f32.mrb[3].mxu1  ;;  %v288_v59 = vadd.f32 %v287_v55, %v212_v45  ;;  %v289_v60 = vpop.f32.mrb[3].mxu0  ;;  %v333_v63 = vmax.f32 %v284_v51, 0.0  ;;  %v3041_v44 = vld [vmem:[#allocation2 + $0x300] ss:$12 sps:$4 sm:$0xff]  }
 0x12c   : > { %846 = vmax.xlane.f32.xlu0 %v845_v56  ;;  %v290_v61 = vadd.f32 %v289_v60, %v216_v46  ;;  %v334_v3 = vmax.f32 %v286_v54, 0.0  ;;  %829 = vmatpush1.bf16.msra.mxu1 %v3041_v44  ;;  %v3541_v54 = vld [vmem:[#allocation2 + $0x6e0] ss:$12 sps:$4 sm:$0xff]   ;;  %v626_v44 = vld [vmem:[#allocation5 + $0x2] ss:$8 sm:$0x3] }
 0x12d   : > { %v848_v62 = vsel %vm245_vm1, %v3526_v57, -inf  ;;  %v335_v2 = vmax.f32 %v288_v59, 0.0  ;;  %2794 = vmatprep.subr.bf16.mxu1 %v3353_v0 }
 0x12e   : > { %v336_v4 = vmax.f32 %v290_v61, 0.0 }
 0x12f   : > { %v369_v5 = vpack.c.bf16 %v335_v2, %v333_v63 }
 0x130   : > { %849 = vmax.xlane.f32.xlu0 %v848_v62  ;;  %v370_v6 = vpack.c.bf16 %v336_v4, %v334_v3 }
 0x132   : > { %576 = vmatprep.mubr.bf16.mxu0 %v370_v6 }
 0x133   : > { %577 = vmatmul.mubr.bf16.vlgmr.msra.gmra.mrb[4].mxu0 %v369_v5 }
 0x134   : > { %913 = vmatprep.mubr.bf16.mxu0 %v3355_v1  ;;  %882 = vmatpush1.bf16.msra.mxu0 %v3531_v7 }
 0x135   : > { %2788 = vmatprep.subr.bf16.mxu0 %v3353_v0 }
 0x1b9   : > { %v847_v45 = vpop.xlane.xlu0 %846 }
 0x1ba   : > { %v851_v46 = vsub.f32 %v3522_v48, %v847_v45  ;;  %v372_v48 = vld [vmem:[#allocation5 + $0x1] ss:$8 sm:$0x3]  ;;  %v631_v45 = vrot.slane %v626_v44, %v3513_v42 }
 0x1bb   : > { %v377_v56 = vrot.slane %v372_v48, %v3513_v42 }
 0x1bc   : > { %v853_v47 = vmul.f32 1.442695, %v851_v46  ;;  %v635_v46 = vrot.slane %v626_v44, %v3516_v43  ;;  %v3081_v44 = vld [vmem:[#allocation2 + $0x390] ss:$12 sps:$4 sm:$0xff]  }
 0x1bd   : > { %v850_v49 = vpop.xlane.xlu0 %849 }
 0x1be   : > { %v852_v50 = vsub.f32 %v3526_v57, %v850_v49  ;;  %3205 = vpow2.f32 %v853_v47  ;;  %v381_v57 = vrot.slane %v372_v48, %v3516_v43 }
 0x1c0   : > { %v855_v51 = vmul.f32 1.442695, %v852_v50 }
 0x1c2   : > { %3207 = vpow2.f32 %v855_v51 }
 0x1c8   : > { %v3206_v52 = vpop.eup %3205 }
 0x1cc   : > { %v3208_v53 = vpop.eup %3207 }
 0x1cd   : > { %v861_v55 = vpack.c.bf16 %v3208_v53, %v3206_v52 }
 0x1cf   : > { %2568 = vmatmul.mubr.msk.bf16.vlgmr.msra.gmra.mrb[8].mxu0 %vm245_vm1, %v861_v55 }
 0x1d0   : > { %2789 = vmatpush3.bf16.msra.mxu0 %v3541_v54  ;;  %2790 = vmatprep.mubr.msk.bf16.mxu0 %vm3354_vm0, %v3353_v0 }
 0x1d1   : > { %2705 = vmatprep.subr.bf16.mxu0 %v3555_v13 }
 0x1d7   : > { %2791 = vmatmul.mubr.msk.bf16.vlgmr.msra.gmra.mrb[12].mxu0 %vm245_vm1, %v861_v55 }
 0x1d8   : > { %2706 = vmatpush3.bf16.msra.mxu0 %v3557_v14 }
 0x1d9   : > { %2707 = vmatprep.subr.bf16.mxu0 %v3559_v15 }
 0x1dc   : > { %2708 = vmatpush3.bf16.msra.mxu0 %v3563_v16 }
 0x1dd   : > { %2709 = vmatprep.subr.bf16.mxu0 %v3566_v17 }
 0x1e0   : > { %2710 = vmatpush3.bf16.msra.mxu0 %v3569_v18 }
 0x1e1   : > { %2711 = vmatprep.subr.bf16.mxu0 %v3572_v19 }
 0x1e4   : > { %2712 = vmatpush3.bf16.msra.mxu0 %v3575_v20 }
 0x1e5   : > { %2713 = vmatprep.subr.bf16.mxu0 %v3578_v21 }
 0x1e8   : > { %2714 = vmatpush3.bf16.msra.mxu0 %v3581_v22 }
 0x1e9   : > { %2715 = vmatprep.subr.bf16.mxu0 %v3585_v23 }
 0x1ec   : > { %2716 = vmatpush3.bf16.msra.mxu0 %v3587_v24 }
 0x1ed   : > { %2717 = vmatprep.subr.bf16.mxu0 %v3591_v25 }
 0x1f0   : > { %2718 = vmatpush3.bf16.msra.mxu0 %v3593_v26 }
 0x1f1   : > { %2719 = vmatprep.subr.bf16.mxu0 %v3597_v27 }
 0x1f4   : > { %2720 = vmatpush3.bf16.msra.mxu0 %v3599_v28 }
 0x1f5   : > { %2800 = vmatprep.subr.bf16.mxu0 %v3353_v0 }
 0x206   : > { %v578_v58 = vpop.f32.mrb[4].mxu0 }
 0x207   : > { %v579_v59 = vadd.f32 %v578_v58, %v377_v56  ;;  %v580_v60 = vpop.f32.mrb[5].mxu0 }
 0x208   : > { %v581_v61 = vadd.f32 %v580_v60, %v381_v57  ;;  %v582_v62 = vpop.f32.mrb[6].mxu0 }
 0x209   : > { %v583_v63 = vadd.f32 %v582_v62, %v377_v56  ;;  %v584_v2 = vpop.f32.mrb[7].mxu0  ;;  %v587_v4 = vmax.f32 %v579_v59, 0.0 }
 0x20a   : > { %v585_v3 = vadd.f32 %v584_v2, %v381_v57  ;;  %v588_v6 = vmax.f32 %v581_v61, 0.0 }
 0x20b   : > { %v589_v5 = vmax.f32 %v583_v63, 0.0 }
 0x20c   : > { %v590_v9 = vmax.f32 %v585_v3, 0.0 }
 0x20d   : > { %v623_v10 = vpack.c.bf16 %v589_v5, %v587_v4  ;;  %v3061_v4 = vld [vmem:[#allocation2 + $0x318] ss:$12 sps:$4 sm:$0xff]   ;;  %v3063_v5 = vld [vmem:[#allocation2 + $0x31c] ss:$12 sps:$4 sm:$0xff]  }
 0x20e   : > { %v624_v11 = vpack.c.bf16 %v590_v9, %v588_v6  ;;  %v3064_v6 = vld [vmem:[#allocation2 + $0x320] ss:$12 sps:$4 sm:$0xff]  }
 0x20f   : > { %v3067_v9 = vld [vmem:[#allocation2 + $0x334] ss:$12 sps:$4 sm:$0xff]  }
 0x210   : > { %830 = vmatprep.mubr.bf16.mxu1 %v624_v11  ;;  %v3065_v11 = vld [vmem:[#allocation2 + $0x330] ss:$12 sps:$4 sm:$0xff]  }
 0x211   : > { %831 = vmatmul.mubr.bf16.vlgmr.msra.gmra.mrb[4].mxu1 %v623_v10  ;;  %v3068_v10 = vld [vmem:[#allocation2 + $0x338] ss:$12 sps:$4 sm:$0xff]  }
 0x212   : > { %2796 = vmatprep.mubr.msk.bf16.mxu1 %vm3354_vm0, %v3353_v0  ;;  %2795 = vmatpush3.bf16.msra.mxu1 %v3552_v12 }
 0x213   : > { %1376 = vmatprep.subr.bf16.mxu1 %v3063_v5  ;;  %v3098_v5 = vld [vmem:[#allocation2 + $0x3f4] ss:$12 sps:$4 sm:$0xff]  }
 0x2a2   : > { %v915_v29 = vpop.f32.mrb[8].mxu0 }
 0x2a3   : > { %v917_v30 = vpop.f32.mrb[9].mxu0 }
 0x2a4   : > { %v919_v31 = vpop.f32.mrb[10].mxu0 }
 0x2a5   : > { %v921_v32 = vpop.f32.mrb[11].mxu0 }
 0x2aa   : > { %v958_v33 = vpop.f32.mrb[12].mxu0 }
 0x2ab   : > { %v2792_v34 = vpop.f32.mrb[13].mxu0  ;;  %3209 = vrcp.f32 %v958_v33  ;;  %v3076_v33 = vld [vmem:[#allocation2 + $0x368] ss:$12 sps:$4 sm:$0xff]  }
 0x2ac   : > { %v961_v35 = vpop.f32.mrb[14].mxu0  ;;  %v3073_v34 = vld [vmem:[#allocation2 + $0x360] ss:$12 sps:$4 sm:$0xff]  }
 0x2ad   : > { %3211 = vrcp.f32 %v961_v35  ;;  %v2793_v36 = vpop.f32.mrb[15].mxu0  ;;  %v3079_v35 = vld [vmem:[#allocation2 + $0x37c] ss:$12 sps:$4 sm:$0xff]  }
 0x2ae   : > { %v3080_v36 = vld [vmem:[#allocation2 + $0x380] ss:$12 sps:$4 sm:$0xff]  }
 0x2b5   : > { %v3210_v37 = vpop.eup %3209 }
 0x2b7   : > { %v3212_v38 = vpop.eup %3211 }
 0x2b8   : > { %v1144_v41 = vpack.c.bf16 %v3212_v38, %v3210_v37  ;;  %v3077_v37 = vld [vmem:[#allocation2 + $0x378] ss:$12 sps:$4 sm:$0xff]   ;;  %v3083_v38 = vld [vmem:[#allocation2 + $0x394] ss:$12 sps:$4 sm:$0xff]  }
 0x2ba   : > { %2797 = vmatmul.mubr.msk.bf16.vlgmr.msra.gmra.mrb[8].mxu1 %vm245_vm1, %v1144_v41  ;;  %v3084_v41 = vld [vmem:[#allocation2 + $0x398] ss:$12 sps:$4 sm:$0xff]  }
 0x2bb   : > { %1408 = vmatprep.mubr.bf16.mxu1 %v3355_v1  ;;  %1377 = vmatpush1.bf16.msra.mxu1 %v3061_v4 }
 0x2bc   : > { %1378 = vmatprep.subr.bf16.mxu1 %v3067_v9  ;;  %v3101_v9 = vld [vmem:[#allocation2 + $0x40c] ss:$12 sps:$4 sm:$0xff]  }
 0x2bf   : > { %1379 = vmatpush1.bf16.msra.mxu1 %v3065_v11  ;;  %v3104_v11 = vld [vmem:[#allocation2 + $0x424] ss:$12 sps:$4 sm:$0xff]  }
 0x2e4   : > { %v832_v47 = vpop.f32.mrb[4].mxu1 }
 0x2e5   : > { %v833_v49 = vadd.f32 %v832_v47, %v631_v45  ;;  %v834_v50 = vpop.f32.mrb[5].mxu1  ;;  %v3088_v47 = vld [vmem:[#allocation2 + $0x3b0] ss:$12 sps:$4 sm:$0xff]  }
 0x2e6   : > { %v835_v51 = vadd.f32 %v834_v50, %v635_v46  ;;  %v836_v52 = vpop.f32.mrb[6].mxu1  ;;  %v3089_v50 = vld [vmem:[#allocation2 + $0x3c0] ss:$12 sps:$4 sm:$0xff]  }
 0x2e7   : > { %v841_v53 = vmax.f32 %v833_v49, 0.0  ;;  %v837_v55 = vadd.f32 %v836_v52, %v631_v45  ;;  %v838_v48 = vpop.f32.mrb[7].mxu1  ;;  %v3087_v45 = vld [vmem:[#allocation2 + $0x3ac] ss:$12 sps:$4 sm:$0xff]   ;;  %v3091_v49 = vld [vmem:[#allocation2 + $0x3c4] ss:$12 sps:$4 sm:$0xff]  }
 0x2e8   : > { %v842_v56 = vmax.f32 %v835_v51, 0.0  ;;  %v839_v57 = vadd.f32 %v838_v48, %v635_v46  ;;  %v3085_v46 = vld [vmem:[#allocation2 + $0x3a8] ss:$12 sps:$4 sm:$0xff]  }
 0x2e9   : > { %v965_v58 = vmul.f32 %v915_v29, %v841_v53  ;;  %v843_v59 = vmax.f32 %v837_v55, 0.0  ;;  %v3071_v29 = vld [vmem:[#allocation2 + $0x34c] ss:$12 sps:$4 sm:$0xff]   ;;  %v3092_v51 = vld [vmem:[#allocation2 + $0x3c8] ss:$12 sps:$4 sm:$0xff]  }
 0x2ea   : > { %v966_v60 = vmul.f32 %v917_v30, %v842_v56  ;;  %v844_v61 = vmax.f32 %v839_v57, 0.0  ;;  %v3072_v30 = vld [vmem:[#allocation2 + $0x350] ss:$12 sps:$4 sm:$0xff]   ;;  %1380 = vmatprep.subr.bf16.mxu1 %v3071_v29  ;;  %v3102_v29 = vld [vmem:[#allocation2 + $0x420] ss:$12 sps:$4 sm:$0xff]  }
 0x2eb   : > { %v967_v62 = vmul.f32 %v919_v31, %v843_v59  ;;  %v3069_v31 = vld [vmem:[#allocation2 + $0x348] ss:$12 sps:$4 sm:$0xff]  }
 0x2ec   : > { %v968_v63 = vmul.f32 %v921_v32, %v844_v61  ;;  %v3075_v32 = vld [vmem:[#allocation2 + $0x364] ss:$12 sps:$4 sm:$0xff]   ;;  %1381 = vmatpush1.bf16.msra.mxu1 %v3069_v31  ;;  %v3095_v52 = vld [vmem:[#allocation2 + $0x3dc] ss:$12 sps:$4 sm:$0xff]  }
 0x2ed   : > { %v1001_v2 = vpack.c.bf16 %v967_v62, %v965_v58  ;;  %1382 = vmatprep.subr.bf16.mxu1 %v3075_v32  ;;  %v3105_v31 = vld [vmem:[#allocation2 + $0x438] ss:$12 sps:$4 sm:$0xff]   ;;  %v3110_v32 = vld [vmem:[#allocation2 + $0x454] ss:$12 sps:$4 sm:$0xff]  }
 0x2ee   : > { %v1002_v3 = vpack.c.bf16 %v968_v63, %v966_v60 }
 0x2f0   : > { %1131 = vmatprep.mubr.bf16.mxu0 %v1002_v3  ;;  %1383 = vmatpush1.bf16.msra.mxu1 %v3073_v34  ;;  %v3093_v3 = vld [vmem:[#allocation2 + $0x3d8] ss:$12 sps:$4 sm:$0xff]  }
 0x2f1   : > { %1132 = vmatmul.mubr.bf16.vlgmr.msra.gmra.mrb[16].mxu0 %v1001_v2  ;;  %1384 = vmatprep.subr.bf16.mxu1 %v3079_v35  ;;  %v3113_v34 = vld [vmem:[#allocation2 + $0x46c] ss:$12 sps:$4 sm:$0xff]   ;;  %v3111_v35 = vld [vmem:[#allocation2 + $0x468] ss:$12 sps:$4 sm:$0xff]  }
 0x2f2   : > { %2816 = vmatprep.mubr.msk.bf16.mxu0 %vm3354_vm0, %v3353_v0  ;;  %2801 = vmatpush3.bf16.msra.mxu0 %v3064_v6  ;;  %v3096_v6 = vld [vmem:[#allocation2 + $0x3f0] ss:$12 sps:$4 sm:$0xff]  }
 0x2f3   : > { %2802 = vmatprep.subr.bf16.mxu0 %v3353_v0 }
 0x2f4   : > { %1385 = vmatpush1.bf16.msra.mxu1 %v3077_v37  ;;  %v3114_v37 = vld [vmem:[#allocation2 + $0x480] ss:$12 sps:$4 sm:$0xff]  }
 0x2f5   : > { %1386 = vmatprep.subr.bf16.mxu1 %v3083_v38  ;;  %v3119_v38 = vld [vmem:[#allocation2 + $0x49c] ss:$12 sps:$4 sm:$0xff]  }
 0x2f6   : > { %2803 = vmatpush3.bf16.msra.mxu0 %v3068_v10  ;;  %v3099_v10 = vld [vmem:[#allocation2 + $0x408] ss:$12 sps:$4 sm:$0xff]  }
 0x2f7   : > { %2804 = vmatprep.subr.bf16.mxu0 %v3353_v0 }
 0x2f8   : > { %1387 = vmatpush1.bf16.msra.mxu1 %v3081_v44  ;;  %v3122_v44 = vld [vmem:[#allocation2 + $0x4b4] ss:$12 sps:$4 sm:$0xff]  }
 0x2f9   : > { %1388 = vmatprep.subr.bf16.mxu1 %v3087_v45  ;;  %v3120_v45 = vld [vmem:[#allocation2 + $0x4b0] ss:$12 sps:$4 sm:$0xff]  }
 0x2fa   : > { %2805 = vmatpush3.bf16.msra.mxu0 %v3072_v30  ;;  %v3107_v30 = vld [vmem:[#allocation2 + $0x43c] ss:$12 sps:$4 sm:$0xff]  }
 0x2fb   : > { %2806 = vmatprep.subr.bf16.mxu0 %v3353_v0 }
 0x2fc   : > { %1389 = vmatpush1.bf16.msra.mxu1 %v3085_v46  ;;  %v3125_v46 = vld [vmem:[#allocation2 + $0x4cc] ss:$12 sps:$4 sm:$0xff]  }
 0x2fd   : > { %1390 = vmatprep.subr.bf16.mxu1 %v3091_v49  ;;  %v3128_v49 = vld [vmem:[#allocation2 + $0x4e4] ss:$12 sps:$4 sm:$0xff]  }
 0x2fe   : > { %2807 = vmatpush3.bf16.msra.mxu0 %v3076_v33  ;;  %v3108_v33 = vld [vmem:[#allocation2 + $0x450] ss:$12 sps:$4 sm:$0xff]  }
 0x2ff   : > { %2808 = vmatprep.subr.bf16.mxu0 %v3353_v0 }
 0x300   : > { %1391 = vmatpush1.bf16.msra.mxu1 %v3089_v50  ;;  %v3126_v50 = vld [vmem:[#allocation2 + $0x4e0] ss:$12 sps:$4 sm:$0xff]  }
 0x301   : > { %1671 = vmatprep.subr.bf16.mxu1 %v3095_v52  ;;  %v3129_v52 = vld [vmem:[#allocation2 + $0x4f8] ss:$12 sps:$4 sm:$0xff]  }
 0x302   : > { %2809 = vmatpush3.bf16.msra.mxu0 %v3080_v36  ;;  %v3116_v36 = vld [vmem:[#allocation2 + $0x484] ss:$12 sps:$4 sm:$0xff]  }
 0x303   : > { %2810 = vmatprep.subr.bf16.mxu0 %v3353_v0 }
 0x306   : > { %2811 = vmatpush3.bf16.msra.mxu0 %v3084_v41  ;;  %v3117_v41 = vld [vmem:[#allocation2 + $0x498] ss:$12 sps:$4 sm:$0xff]  }
 0x307   : > { %2812 = vmatprep.subr.bf16.mxu0 %v3353_v0 }
 0x30a   : > { %2813 = vmatpush3.bf16.msra.mxu0 %v3088_v47  ;;  %v3123_v47 = vld [vmem:[#allocation2 + $0x4c8] ss:$12 sps:$4 sm:$0xff]  }
 0x30b   : > { %2814 = vmatprep.subr.bf16.mxu0 %v3353_v0 }
 0x30e   : > { %2815 = vmatpush3.bf16.msra.mxu0 %v3092_v51  ;;  %v3131_v51 = vld [vmem:[#allocation2 + $0x4fc] ss:$12 sps:$4 sm:$0xff]  }
 0x38d   : > { %v1188_v53 = vpop.f32.mrb[8].mxu1 }
 0x38e   : > { %v2798_v55 = vpop.f32.mrb[9].mxu1 }
 0x38f   : > { %v1191_v48 = vpop.f32.mrb[10].mxu1  ;;  %v3132_v55 = vld [vmem:[#allocation2 + $0x510] ss:$12 sps:$4 sm:$0xff]  }
 0x390   : > { %v2799_v56 = vpop.f32.mrb[11].mxu1 }
 0x391   : > { %v3135_v56 = vld [vmem:[#allocation2 + $0x528] ss:$12 sps:$4 sm:$0xff]  }
 0x3c4   : > { %v2721_v57 = vpop.f32.mrb[16].mxu0 }
 0x3c5   : > { %v2722_v58 = vpop.f32.mrb[17].mxu0 }
 0x3c6   : > { %v2723_v59 = vadd.f32 %v2722_v58, %v2721_v57  ;;  %v2724_v60 = vpop.f32.mrb[18].mxu0  ;;  %v3140_v57 = vld [vmem:[#allocation2 + $0x544] ss:$12 sps:$4 sm:$0xff]   ;;  %v3138_v58 = vld [vmem:[#allocation2 + $0x540] ss:$12 sps:$4 sm:$0xff]  }
 0x3c7   : > { %v2725_v61 = vpop.f32.mrb[19].mxu0 }
 0x3c8   : > { %v1195_v62 = vmul.f32 %v2723_v59, %v1188_v53  ;;  %v2726_v63 = vadd.f32 %v2725_v61, %v2724_v60  ;;  %v3134_v53 = vld [vmem:[#allocation2 + $0x514] ss:$12 sps:$4 sm:$0xff]   ;;  %v1231_v59 = vld [vmem:[#allocation5 + $0x3] ss:$8 sm:$0x7] }
 0x3c9   : > { %v1236_v60 = vrot.slane %v1231_v59, %v3513_v42  ;;  %v1244_v61 = vrot.slane %v1231_v59, %v219_v40 }
 0x3ca   : > { %v1196_v2 = vmul.f32 %v2726_v63, %v1191_v48  ;;  %v3137_v48 = vld [vmem:[#allocation2 + $0x52c] ss:$12 sps:$4 sm:$0xff]  }
 0x3cc   : > { %v1229_v4 = vpack.c.bf16 %v1196_v2, %v1195_v62  ;;  %v1240_v62 = vrot.slane %v1231_v59, %v3516_v43  ;;  %v3165_v59 = vld [vmem:[#allocation2 + $0x618] ss:$12 sps:$4 sm:$0xff]  }
 0x3ce   : > { %1409 = vmatmul.mubr.bf16.vlgmr.msra.gmra.mrb[12].mxu1 %v1229_v4  ;;  %2817 = vmatmul.mubr.bf16.vlgmr.msra.gmra.mrb[20].mxu0 %v1229_v4 }
 0x3cf   : > { %1672 = vmatpush1.bf16.msra.mxu1 %v3093_v3 }
 0x3d0   : > { %1673 = vmatprep.subr.bf16.mxu1 %v3098_v5 }
 0x3d3   : > { %1674 = vmatpush1.bf16.msra.mxu1 %v3096_v6 }
 0x3d4   : > { %1675 = vmatprep.subr.bf16.mxu1 %v3101_v9 }
 0x3d7   : > { %1676 = vmatpush1.bf16.msra.mxu1 %v3099_v10 }
 0x3d8   : > { %1677 = vmatprep.subr.bf16.mxu1 %v3104_v11 }
 0x3db   : > { %1678 = vmatpush1.bf16.msra.mxu1 %v3102_v29 }
 0x3dc   : > { %1679 = vmatprep.subr.bf16.mxu1 %v3107_v30 }
 0x3df   : > { %1680 = vmatpush1.bf16.msra.mxu1 %v3105_v31 }
 0x3e0   : > { %1681 = vmatprep.subr.bf16.mxu1 %v3110_v32 }
 0x3e3   : > { %1682 = vmatpush1.bf16.msra.mxu1 %v3108_v33 }
 0x3e4   : > { %1683 = vmatprep.subr.bf16.mxu1 %v3113_v34 }
 0x3e7   : > { %1684 = vmatpush1.bf16.msra.mxu1 %v3111_v35 }
 0x3e8   : > { %1685 = vmatprep.subr.bf16.mxu1 %v3116_v36 }
 0x3eb   : > { %1686 = vmatpush1.bf16.msra.mxu1 %v3114_v37 }
 0x3ec   : > { %1687 = vmatprep.subr.bf16.mxu1 %v3119_v38 }
 0x3ef   : > { %1688 = vmatpush1.bf16.msra.mxu1 %v3117_v41  ;;  %v3141_v41 = vld [vmem:[#allocation2 + $0x558] ss:$12 sps:$4 sm:$0xff]  }
 0x3f0   : > { %1689 = vmatprep.subr.bf16.mxu1 %v3122_v44  ;;  %v3143_v44 = vld [vmem:[#allocation2 + $0x55c] ss:$12 sps:$4 sm:$0xff]  }
 0x3f1   : > { %1925 = vmatprep.subr.bf16.mxu0 %v3143_v44 }
 0x3f2   : > { %1926 = vmatpush1.bf16.msra.mxu0 %v3141_v41 }
 0x3f3   : > { %1690 = vmatpush1.bf16.msra.mxu1 %v3120_v45  ;;  %v3146_v45 = vld [vmem:[#allocation2 + $0x574] ss:$12 sps:$4 sm:$0xff]  }
 0x3f4   : > { %1691 = vmatprep.subr.bf16.mxu1 %v3125_v46  ;;  %v3144_v46 = vld [vmem:[#allocation2 + $0x570] ss:$12 sps:$4 sm:$0xff]   ;;  %1927 = vmatprep.subr.bf16.mxu0 %v3146_v45 }
 0x3f6   : > { %1928 = vmatpush1.bf16.msra.mxu0 %v3144_v46 }
 0x3f7   : > { %1692 = vmatpush1.bf16.msra.mxu1 %v3123_v47  ;;  %v3147_v47 = vld [vmem:[#allocation2 + $0x588] ss:$12 sps:$4 sm:$0xff]  }
 0x3f8   : > { %1693 = vmatprep.subr.bf16.mxu1 %v3128_v49  ;;  %v3149_v49 = vld [vmem:[#allocation2 + $0x58c] ss:$12 sps:$4 sm:$0xff]  }
 0x3f9   : > { %1929 = vmatprep.subr.bf16.mxu0 %v3149_v49 }
 0x3fa   : > { %1930 = vmatpush1.bf16.msra.mxu0 %v3147_v47 }
 0x3fb   : > { %1694 = vmatpush1.bf16.msra.mxu1 %v3126_v50  ;;  %v3152_v50 = vld [vmem:[#allocation2 + $0x5a4] ss:$12 sps:$4 sm:$0xff]  }
 0x3fc   : > { %1695 = vmatprep.subr.bf16.mxu1 %v3131_v51  ;;  %v3150_v51 = vld [vmem:[#allocation2 + $0x5a0] ss:$12 sps:$4 sm:$0xff]   ;;  %1931 = vmatprep.subr.bf16.mxu0 %v3152_v50 }
 0x3fe   : > { %1932 = vmatpush1.bf16.msra.mxu0 %v3150_v51 }
 0x3ff   : > { %1696 = vmatpush1.bf16.msra.mxu1 %v3129_v52  ;;  %v3158_v52 = vld [vmem:[#allocation2 + $0x5d4] ss:$12 sps:$4 sm:$0xff]  }
 0x400   : > { %1697 = vmatprep.subr.bf16.mxu1 %v3134_v53  ;;  %v3156_v53 = vld [vmem:[#allocation2 + $0x5d0] ss:$12 sps:$4 sm:$0xff]  }
 0x403   : > { %1698 = vmatpush1.bf16.msra.mxu1 %v3132_v55  ;;  %v3161_v55 = vld [vmem:[#allocation2 + $0x5ec] ss:$12 sps:$4 sm:$0xff]  }
 0x404   : > { %1699 = vmatprep.subr.bf16.mxu1 %v3137_v48  ;;  %v3159_v48 = vld [vmem:[#allocation2 + $0x5e8] ss:$12 sps:$4 sm:$0xff]  }
 0x407   : > { %1700 = vmatpush1.bf16.msra.mxu1 %v3135_v56  ;;  %v3164_v56 = vld [vmem:[#allocation2 + $0x604] ss:$12 sps:$4 sm:$0xff]  }
 0x408   : > { %1701 = vmatprep.subr.bf16.mxu1 %v3140_v57  ;;  %v3162_v57 = vld [vmem:[#allocation2 + $0x600] ss:$12 sps:$4 sm:$0xff]  }
 0x40b   : > { %1702 = vmatpush1.bf16.msra.mxu1 %v3138_v58  ;;  %v3167_v58 = vld [vmem:[#allocation2 + $0x61c] ss:$12 sps:$4 sm:$0xff]  }
 0x40c   : > { %1988 = vmatprep.subr.bf16.mxu1 %v3533_v8 }
 0x4a1   : > { %v1410_v63 = vpop.f32.mrb[12].mxu1  ;;  %v1453_v2 = vpop.f32.mrb[20].mxu0 }
 0x4a2   : > { %v1411_v3 = vadd.f32 %v1410_v63, %v1236_v60  ;;  %v3622_v4 = vadd.f32 %v1453_v2, %v1244_v61  ;;  %v1412_v5 = vpop.f32.mrb[13].mxu1  ;;  %v2818_v6 = vpop.f32.mrb[21].mxu0  ;;  %v3171_v63 = vld [vmem:[#allocation2 + $0x648] ss:$12 sps:$4 sm:$0xff]   ;;  %v3176_v2 = vld [vmem:[#allocation2 + $0x664] ss:$12 sps:$4 sm:$0xff]  }
 0x4a3   : > { %v1413_v9 = vadd.f32 %v1412_v5, %v1240_v62  ;;  %v1414_v10 = vpop.f32.mrb[14].mxu1  ;;  %v1456_v11 = vpop.f32.mrb[22].mxu0  ;;  %v3179_v5 = vld [vmem:[#allocation2 + $0x67c] ss:$12 sps:$4 sm:$0xff]   ;;  %v3177_v6 = vld [vmem:[#allocation2 + $0x678] ss:$12 sps:$4 sm:$0xff]  }
 0x4a4   : > { %v1415_v29 = vadd.f32 %v1414_v10, %v1236_v60  ;;  %v3624_v8 = vadd.f32 %v1456_v11, %v1244_v61  ;;  %v1416_v30 = vpop.f32.mrb[15].mxu1  ;;  %v2819_v31 = vpop.f32.mrb[23].mxu0  ;;  %v1972_v39 = vsel %vm245_vm1, %v3622_v4, -inf  ;;  %v1460_v32 = vmax.f32 %v1411_v3, 0.0  ;;  %v3170_v60 = vld [vmem:[#allocation2 + $0x634] ss:$12 sps:$4 sm:$0xff]  }
 0x4a5   : > { %v1417_v40 = vadd.f32 %v1416_v30, %v1240_v62  ;;  %1973 = vmax.xlane.f32.xlu1 %v1972_v39  ;;  %v1461_v34 = vmax.f32 %v1413_v9, 0.0  ;;  %v3168_v61 = vld [vmem:[#allocation2 + $0x630] ss:$12 sps:$4 sm:$0xff]   ;;  %v3173_v62 = vld [vmem:[#allocation2 + $0x64c] ss:$12 sps:$4 sm:$0xff]  }
 0x4a6   : > { %v1462_v33 = vmax.f32 %v1415_v29, 0.0  ;;  %v1975_v37 = vsel %vm245_vm1, %v3624_v8, -inf  ;;  %v3174_v3 = vld [vmem:[#allocation2 + $0x660] ss:$12 sps:$4 sm:$0xff]   ;;  %v3180_v10 = vld [vmem:[#allocation2 + $0x690] ss:$12 sps:$4 sm:$0xff]  }
 0x4a7   : > { %v1463_v35 = vmax.f32 %v1417_v40, 0.0  ;;  %v3182_v9 = vld [vmem:[#allocation2 + $0x694] ss:$12 sps:$4 sm:$0xff]   ;;  %v3185_v11 = vld [vmem:[#allocation2 + $0x6ac] ss:$12 sps:$4 sm:$0xff]  }
 0x4a8   : > { %v1496_v36 = vpack.c.bf16 %v1462_v33, %v1460_v32  ;;  %v3183_v29 = vld [vmem:[#allocation2 + $0x6a8] ss:$12 sps:$4 sm:$0xff]   ;;  %v3188_v30 = vld [vmem:[#allocation2 + $0x6c4] ss:$12 sps:$4 sm:$0xff]   ;;  %v3186_v31 = vld [vmem:[#allocation2 + $0x6c0] ss:$12 sps:$4 sm:$0xff]  }
 0x4a9   : > { %v1497_v38 = vpack.c.bf16 %v1463_v35, %v1461_v34  ;;  %1976 = vmax.xlane.f32.xlu1 %v1975_v37 }
 0x4ab   : > { %1703 = vmatprep.mubr.bf16.mxu1 %v1497_v38 }
 0x4ac   : > { %1704 = vmatmul.mubr.bf16.vlgmr.msra.gmra.mrb[16].mxu1 %v1496_v36 }
 0x4ad   : > { %1989 = vmatpush1.bf16.msra.mxu1 %v3531_v7  ;;  %2020 = vmatprep.mubr.bf16.mxu1 %v3355_v1  ;;  %v3155_v7 = vld [vmem:[#allocation2 + $0x5bc] ss:$12 sps:$4 sm:$0xff]   ;;  %v3153_v1 = vld [vmem:[#allocation2 + $0x5b8] ss:$12 sps:$4 sm:$0xff]  }
 0x4ae   : > { %2820 = vmatprep.subr.bf16.mxu1 %v3353_v0  ;;  %1933 = vmatprep.subr.bf16.mxu0 %v3155_v7 }
 0x4af   : > { %1934 = vmatpush1.bf16.msra.mxu0 %v3153_v1 }
 0x4b0   : > { %1935 = vmatprep.subr.bf16.mxu0 %v3158_v52 }
 0x4b3   : > { %1936 = vmatpush1.bf16.msra.mxu0 %v3156_v53 }
 0x4b4   : > { %1937 = vmatprep.subr.bf16.mxu0 %v3161_v55 }
 0x4b7   : > { %1938 = vmatpush1.bf16.msra.mxu0 %v3159_v48 }
 0x4b8   : > { %1939 = vmatprep.subr.bf16.mxu0 %v3164_v56 }
 0x4bb   : > { %1940 = vmatpush1.bf16.msra.mxu0 %v3162_v57 }
 0x4bc   : > { %1941 = vmatprep.subr.bf16.mxu0 %v3167_v58 }
 0x4bf   : > { %1942 = vmatpush1.bf16.msra.mxu0 %v3165_v59 }
 0x4c0   : > { %1943 = vmatprep.subr.bf16.mxu0 %v3170_v60 }
 0x4c3   : > { %1944 = vmatpush1.bf16.msra.mxu0 %v3168_v61 }
 0x4c4   : > { %1945 = vmatprep.subr.bf16.mxu0 %v3173_v62 }
 0x4c7   : > { %1946 = vmatpush1.bf16.msra.mxu0 %v3171_v63 }
 0x4c8   : > { %1947 = vmatprep.subr.bf16.mxu0 %v3176_v2 }
 0x4cb   : > { %1948 = vmatpush1.bf16.msra.mxu0 %v3174_v3 }
 0x4cc   : > { %1949 = vmatprep.subr.bf16.mxu0 %v3179_v5 }
 0x4cf   : > { %1950 = vmatpush1.bf16.msra.mxu0 %v3177_v6 }
 0x4d0   : > { %1951 = vmatprep.subr.bf16.mxu0 %v3182_v9 }
 0x4d3   : > { %1952 = vmatpush1.bf16.msra.mxu0 %v3180_v10 }
 0x4d4   : > { %1953 = vmatprep.subr.bf16.mxu0 %v3185_v11  ;;  %v3190_v11 = vld [vmem:[#allocation2 + $0x8a0] ss:$12 sps:$4 sm:$0xff]  }
 0x4d7   : > { %1954 = vmatpush1.bf16.msra.mxu0 %v3183_v29  ;;  %v3191_v29 = vld [vmem:[#allocation2 + $0x8b8] ss:$12 sps:$4 sm:$0xff]  }
 0x4d8   : > { %1955 = vmatprep.subr.bf16.mxu0 %v3188_v30  ;;  %v3192_v30 = vld [vmem:[#allocation2 + $0x8d0] ss:$12 sps:$4 sm:$0xff]  }
 0x4db   : > { %1956 = vmatpush1.bf16.msra.mxu0 %v3186_v31  ;;  %v3193_v31 = vld [vmem:[#allocation2 + $0x8e8] ss:$12 sps:$4 sm:$0xff]  }
 0x4dc   : > { %2826 = vmatprep.subr.bf16.mxu0 %v3353_v0 }
 0x532   : > { %v1974_v39 = vpop.xlane.xlu1 %1973 }
 0x533   : > { %v1978_v40 = vsub.f32 %v3622_v4, %v1974_v39  ;;  %v3194_v39 = vld [vmem:[#allocation2 + $0x900] ss:$12 sps:$4 sm:$0xff]  }
 0x535   : > { %v1980_v32 = vmul.f32 1.442695, %v1978_v40  ;;  %v3195_v40 = vld [vmem:[#allocation2 + $0x918] ss:$12 sps:$4 sm:$0xff]  }
 0x536   : > { %v1977_v33 = vpop.xlane.xlu1 %1976 }
 0x537   : > { %v1979_v34 = vsub.f32 %v3624_v8, %v1977_v33  ;;  %3213 = vpow2.f32 %v1980_v32  ;;  %v3196_v32 = vld [vmem:[#allocation2 + $0x930] ss:$12 sps:$4 sm:$0xff]   ;;  %v3197_v33 = vld [vmem:[#allocation2 + $0x948] ss:$12 sps:$4 sm:$0xff]  }
 0x539   : > { %v1982_v35 = vmul.f32 1.442695, %v1979_v34  ;;  %v3198_v34 = vld [vmem:[#allocation2 + $0x960] ss:$12 sps:$4 sm:$0xff]  }
 0x53b   : > { %3215 = vpow2.f32 %v1982_v35  ;;  %v3199_v35 = vld [vmem:[#allocation2 + $0x978] ss:$12 sps:$4 sm:$0xff]  }
 0x541   : > { %v3214_v36 = vpop.eup %3213 }
 0x545   : > { %v3216_v37 = vpop.eup %3215 }
 0x546   : > { %v1984_v38 = vpack.c.bf16 %v3216_v37, %v3214_v36  ;;  %v3200_v36 = vld [vmem:[#allocation2 + $0x990] ss:$12 sps:$4 sm:$0xff]   ;;  %v3201_v37 = vld [vmem:[#allocation2 + $0x9a8] ss:$12 sps:$4 sm:$0xff]  }
 0x548   : > { %2676 = vmatmul.mubr.msk.bf16.vlgmr.msra.gmra.mrb[20].mxu1 %vm245_vm1, %v1984_v38 }
 0x549   : > { %2821 = vmatpush3.bf16.msra.mxu1 %v3541_v54  ;;  %2822 = vmatprep.mubr.msk.bf16.mxu1 %vm3354_vm0, %v3353_v0  ;;  %v1499_v54 = vld [vmem:[#allocation5 + $0x4] ss:$8 sm:$0x3] }
 0x54a   : > { %2740 = vmatprep.subr.bf16.mxu1 %v3555_v13  ;;  %v1504_v13 = vrot.slane %v1499_v54, %v3513_v42 }
 0x550   : > { %2823 = vmatmul.mubr.msk.bf16.vlgmr.msra.gmra.mrb[24].mxu1 %vm245_vm1, %v1984_v38  ;;  %v3202_v38 = vld [vmem:[#allocation2 + $0x9c0] ss:$12 sps:$4 sm:$0xff]  }
 0x551   : > { %2741 = vmatpush3.bf16.msra.mxu1 %v3557_v14  ;;  %v1508_v14 = vrot.slane %v1499_v54, %v3516_v43 }
 0x552   : > { %2742 = vmatprep.subr.bf16.mxu1 %v3559_v15 }
 0x555   : > { %2743 = vmatpush3.bf16.msra.mxu1 %v3563_v16 }
 0x556   : > { %2744 = vmatprep.subr.bf16.mxu1 %v3566_v17 }
 0x559   : > { %2745 = vmatpush3.bf16.msra.mxu1 %v3569_v18 }
 0x55a   : > { %2746 = vmatprep.subr.bf16.mxu1 %v3572_v19 }
 0x55d   : > { %2747 = vmatpush3.bf16.msra.mxu1 %v3575_v20 }
 0x55e   : > { %2748 = vmatprep.subr.bf16.mxu1 %v3578_v21 }
 0x561   : > { %2749 = vmatpush3.bf16.msra.mxu1 %v3581_v22 }
 0x562   : > { %2750 = vmatprep.subr.bf16.mxu1 %v3585_v23 }
 0x565   : > { %2751 = vmatpush3.bf16.msra.mxu1 %v3587_v24 }
 0x566   : > { %2752 = vmatprep.subr.bf16.mxu1 %v3591_v25 }
 0x569   : > { %2753 = vmatpush3.bf16.msra.mxu1 %v3593_v26 }
 0x56a   : > { %2754 = vmatprep.subr.bf16.mxu1 %v3597_v27 }
 0x56d   : > { %2755 = vmatpush3.bf16.msra.mxu1 %v3599_v28 }
 0x56e   : > { %2852 = vmatprep.subr.bf16.mxu1 %v3353_v0 }
 0x57f   : > { %v1705_v15 = vpop.f32.mrb[16].mxu1 }
 0x580   : > { %v1706_v16 = vadd.f32 %v1705_v15, %v1504_v13  ;;  %v1707_v17 = vpop.f32.mrb[17].mxu1 }
 0x581   : > { %v1708_v18 = vadd.f32 %v1707_v17, %v1508_v14  ;;  %v1709_v19 = vpop.f32.mrb[18].mxu1 }
 0x582   : > { %v1710_v20 = vadd.f32 %v1709_v19, %v1504_v13  ;;  %v1711_v21 = vpop.f32.mrb[19].mxu1  ;;  %v1714_v23 = vmax.f32 %v1706_v16, 0.0 }
 0x583   : > { %v1712_v22 = vadd.f32 %v1711_v21, %v1508_v14  ;;  %v1715_v25 = vmax.f32 %v1708_v18, 0.0 }
 0x584   : > { %v1716_v24 = vmax.f32 %v1710_v20, 0.0 }
 0x585   : > { %v1717_v26 = vmax.f32 %v1712_v22, 0.0 }
 0x586   : > { %v1750_v27 = vpack.c.bf16 %v1716_v24, %v1714_v23 }
 0x587   : > { %v1751_v28 = vpack.c.bf16 %v1717_v26, %v1715_v25  ;;  %v3203_v25 = vld [vmem:[#allocation2 + $0x9d8] ss:$12 sps:$4 sm:$0xff]   ;;  %v3204_v26 = vld [vmem:[#allocation2 + $0x9f0] ss:$12 sps:$4 sm:$0xff]  }
 0x589   : > { %1957 = vmatprep.mubr.bf16.mxu0 %v1751_v28 }
 0x58a   : > { %1958 = vmatmul.mubr.bf16.vlgmr.msra.gmra.mrb[24].mxu0 %v1750_v27  ;;  %v2185_v27 = vld [vmem:[#allocation5 + $0x6] ss:$0 sm:$0xff] }
 0x58b   : > { %2827 = vmatpush3.bf16.msra.mxu0 %v3552_v12  ;;  %2828 = vmatprep.mubr.msk.bf16.mxu0 %vm3354_vm0, %v3353_v0  ;;  %v1753_v12 = vld [vmem:[#allocation5 + $0x5] ss:$8 sm:$0x3] }
 0x58c   : > { %2832 = vmatprep.subr.bf16.mxu0 %v3353_v0  ;;  %v1758_v1 = vrot.slane %v1753_v12, %v3513_v42  ;;  %v1762_v52 = vrot.slane %v1753_v12, %v3516_v43  ;;  %v3189_v43 = vld [vmem:[#allocation2 + $0x888] ss:$12 sps:$4 sm:$0xff]  }
 0x61b   : > { %v2022_v4 = vpop.f32.mrb[20].mxu1 }
 0x61c   : > { %v2024_v8 = vpop.f32.mrb[21].mxu1 }
 0x61d   : > { %v2026_v41 = vpop.f32.mrb[22].mxu1 }
 0x61e   : > { %v2028_v44 = vpop.f32.mrb[23].mxu1 }
 0x623   : > { %v2065_v45 = vpop.f32.mrb[24].mxu1 }
 0x624   : > { %v2824_v46 = vpop.f32.mrb[25].mxu1  ;;  %3217 = vrcp.f32 %v2065_v45 }
 0x625   : > { %v2068_v47 = vpop.f32.mrb[26].mxu1 }
 0x626   : > { %3219 = vrcp.f32 %v2068_v47  ;;  %v2825_v49 = vpop.f32.mrb[27].mxu1 }
 0x62e   : > { %v3218_v50 = vpop.eup %3217 }
 0x630   : > { %v3220_v51 = vpop.eup %3219 }
 0x631   : > { %v2121_v7 = vpack.c.bf16 %v3220_v51, %v3218_v50  ;;  %v2294_v50 = vld [vmem:[#allocation5 + $0x7] ss:$0 sm:$0xff] }
 0x633   : > { %2829 = vmatmul.mubr.msk.bf16.vlgmr.msra.gmra.mrb[28].mxu0 %vm245_vm1, %v2121_v7 }
 0x634   : > { %2848 = vmatprep.mubr.msk.bf16.mxu0 %vm3354_vm0, %v3353_v0  ;;  %2833 = vmatpush3.bf16.msra.mxu0 %v3189_v43 }
 0x635   : > { %2834 = vmatprep.subr.bf16.mxu0 %v3353_v0 }
 0x638   : > { %2835 = vmatpush3.bf16.msra.mxu0 %v3190_v11 }
 0x639   : > { %2836 = vmatprep.subr.bf16.mxu0 %v3353_v0 }
 0x63c   : > { %2837 = vmatpush3.bf16.msra.mxu0 %v3191_v29 }
 0x63d   : > { %2838 = vmatprep.subr.bf16.mxu0 %v3353_v0 }
 0x640   : > { %2839 = vmatpush3.bf16.msra.mxu0 %v3192_v30 }
 0x641   : > { %2840 = vmatprep.subr.bf16.mxu0 %v3353_v0 }
 0x644   : > { %2841 = vmatpush3.bf16.msra.mxu0 %v3193_v31 }
 0x645   : > { %2842 = vmatprep.subr.bf16.mxu0 %v3353_v0 }
 0x648   : > { %2843 = vmatpush3.bf16.msra.mxu0 %v3194_v39 }
 0x649   : > { %2844 = vmatprep.subr.bf16.mxu0 %v3353_v0 }
 0x64c   : > { %2845 = vmatpush3.bf16.msra.mxu0 %v3195_v40 }
 0x64d   : > { %2846 = vmatprep.subr.bf16.mxu0 %v3353_v0 }
 0x650   : > { %2847 = vmatpush3.bf16.msra.mxu0 %v3196_v32 }
 0x65d   : > { %v1959_v53 = vpop.f32.mrb[24].mxu0 }
 0x65e   : > { %v1960_v55 = vadd.f32 %v1959_v53, %v1758_v1  ;;  %v1961_v48 = vpop.f32.mrb[25].mxu0 }
 0x65f   : > { %v1962_v56 = vadd.f32 %v1961_v48, %v1762_v52  ;;  %v1963_v57 = vpop.f32.mrb[26].mxu0 }
 0x660   : > { %v1968_v58 = vmax.f32 %v1960_v55, 0.0  ;;  %v1964_v59 = vadd.f32 %v1963_v57, %v1758_v1  ;;  %v1965_v60 = vpop.f32.mrb[27].mxu0 }
 0x661   : > { %v1969_v61 = vmax.f32 %v1962_v56, 0.0  ;;  %v1966_v62 = vadd.f32 %v1965_v60, %v1762_v52 }
 0x662   : > { %v2072_v63 = vmul.f32 %v2022_v4, %v1968_v58  ;;  %v1970_v2 = vmax.f32 %v1964_v59, 0.0 }
 0x663   : > { %v2073_v3 = vmul.f32 %v2024_v8, %v1969_v61  ;;  %v1971_v5 = vmax.f32 %v1966_v62, 0.0 }
 0x664   : > { %v2074_v6 = vmul.f32 %v2026_v41, %v1970_v2 }
 0x665   : > { %v2075_v9 = vmul.f32 %v2028_v44, %v1971_v5 }
 0x666   : > { %v2076_v10 = vpack.c.bf16 %v2074_v6, %v2072_v63 }
 0x667   : > { %v2077_v42 = vpack.c.bf16 %v2075_v9, %v2073_v3 }
 0x669   : > { %2110 = vmatprep.mubr.bf16.mxu1 %v2077_v42 }
 0x66a   : > { %2111 = vmatmul.mubr.bf16.vlgmr.msra.gmra.mrb[28].mxu1 %v2076_v10 }
 0x66b   : > { %2868 = vmatprep.mubr.msk.bf16.mxu1 %vm3354_vm0, %v3353_v0  ;;  %2853 = vmatpush3.bf16.msra.mxu1 %v3197_v33 }
 0x66c   : > { %2854 = vmatprep.subr.bf16.mxu1 %v3353_v0 }
 0x66f   : > { %2855 = vmatpush3.bf16.msra.mxu1 %v3198_v34 }
 0x670   : > { %2856 = vmatprep.subr.bf16.mxu1 %v3353_v0 }
 0x673   : > { %2857 = vmatpush3.bf16.msra.mxu1 %v3199_v35 }
 0x674   : > { %2858 = vmatprep.subr.bf16.mxu1 %v3353_v0 }
 0x677   : > { %2859 = vmatpush3.bf16.msra.mxu1 %v3200_v36 }
 0x678   : > { %2860 = vmatprep.subr.bf16.mxu1 %v3353_v0 }
 0x67b   : > { %2861 = vmatpush3.bf16.msra.mxu1 %v3201_v37 }
 0x67c   : > { %2862 = vmatprep.subr.bf16.mxu1 %v3353_v0 }
 0x67f   : > { %2863 = vmatpush3.bf16.msra.mxu1 %v3202_v38 }
 0x680   : > { %2864 = vmatprep.subr.bf16.mxu1 %v3353_v0 }
 0x683   : > { %2865 = vmatpush3.bf16.msra.mxu1 %v3203_v25 }
 0x684   : > { %2866 = vmatprep.subr.bf16.mxu1 %v3353_v0 }
 0x687   : > { %2867 = vmatpush3.bf16.msra.mxu1 %v3204_v26 }
 0x706   : > { %v2159_v54 = vpop.f32.mrb[28].mxu0 }
 0x707   : > { %v2830_v13 = vpop.f32.mrb[29].mxu0 }
 0x708   : > { %v2162_v14 = vpop.f32.mrb[30].mxu0 }
 0x709   : > { %v2831_v15 = vpop.f32.mrb[31].mxu0 }
 0x73d   : > { %v2756_v16 = vpop.f32.mrb[28].mxu1 }
 0x73e   : > { %v2757_v17 = vpop.f32.mrb[29].mxu1 }
 0x73f   : > { %v2758_v18 = vadd.f32 %v2757_v17, %v2756_v16  ;;  %v2759_v19 = vpop.f32.mrb[30].mxu1 }
 0x740   : > { %v2760_v20 = vpop.f32.mrb[31].mxu1 }
 0x741   : > { %v2166_v21 = vmul.f32 %v2758_v18, %v2159_v54  ;;  %v2761_v22 = vadd.f32 %v2760_v20, %v2759_v19 }
 0x743   : > { %v2167_v23 = vmul.f32 %v2761_v22, %v2162_v14 }
 0x745   : > { %v2184_v24 = vpack.c.bf16 %v2167_v23, %v2166_v21 }
 0x747   : > { %2849 = vmatmul.mubr.bf16.vlgmr.msra.gmra.mrb[32].mxu0 %v2184_v24 }
 0x81a   : > { %v2268_v28 = vpop.f32.mrb[32].mxu0 }
 0x81b   : > { %v2269_v4 = vadd.f32 %v2268_v28, %v2185_v27  ;;  %v2850_v8 = vpop.f32.mrb[33].mxu0 }
 0x81c   : > { %v2271_v41 = vpop.f32.mrb[34].mxu0 }
 0x81d   : > { %v2272_v44 = vadd.f32 %v2271_v41, %v2185_v27  ;;  %v2851_v45 = vpop.f32.mrb[35].mxu0  ;;  %v2275_v46 = vmax.f32 %v2269_v4, 0.0 }
 0x81f   : > { %v2276_v47 = vmax.f32 %v2272_v44, 0.0 }
 0x821   : > { %v2293_v49 = vpack.c.bf16 %v2276_v47, %v2275_v46 }
 0x823   : > { %2869 = vmatmul.mubr.bf16.vlgmr.msra.gmra.mrb[32].mxu1 %v2293_v49 }
 0x8f6   : > { %v2377_v0 = vpop.f32.mrb[32].mxu1 }
 0x8f7   : > { %v2378_v51 = vadd.f32 %v2377_v0, %v2294_v50  ;;  %v2870_v7 = vpop.f32.mrb[33].mxu1 }
 0x8f8   : > { %v2380_v12 = vpop.f32.mrb[34].mxu1 }
 0x8f9   : > { %2384 = vst [vmem:[%s192_s20] sm:$0xff] %v2378_v51  ;;  %v2381_v1 = vadd.f32 %v2380_v12, %v2294_v50  ;;  %v2871_v52 = vpop.f32.mrb[35].mxu1 }
 0x8fb   : > { %2385 = vst [vmem:[%s192_s20 + $0x8] sm:$0xff] %v2381_v1 }
 0x8fc   : > { %3290 = shalt.err (!%p3287_p11)
}
 0x8fd   : > { %s3291_s9 = scalar_lea.hbm %s3692_s5, 256  ;;  %s3295_s29 = scalar_lea.hbm %s3738_s3, 512 }
 0x8fe   : > { %p3292_p13 = scmp.ne.s32.totalorder %s3692_s5, %s3291_s9  ;;  %p3296_p6 = scmp.lt.u32.totalorder %s3692_s5, %s3738_s3 }
 0x8ff   : > { %p3297_p9 = scmp.lt.u32.totalorder %s3295_s29, %s3291_s9  ;;  %p3299_p10 = scmp.lt.u32.totalorder %s3291_s9, %s3692_s5 }
 0x900   : > { %p3293_p5 = pnand %p3292_p13, %p3751_p1 }
 0x901   : > { %p3298_p12 = por %p3297_p9, %p3296_p6 }
 0x902   : > { %p3294_p0 = pneg %p3293_p5 }
 0x903   : > { %p3300_p2 = por %p3299_p10, %p3298_p12 }
 0x905   : > { %p3301_p3 = pnand %p3300_p2, %p3294_p0 }
 0x907   : > { %3304 = shalt.err (!%p3301_p3)
}
 0x908   : > { %s3357_s17 = smov 128   ;;  %s3358_s19 = smov 8  }
 0x909   : > { %2880 = dma.vmem_to_hbm [thread:$0]  (%p3751_p1), %s3687_s25, 256, %s3692_s5, %s3694_s6, %s3357_s17, %s3357_s17, %s3358_s19  }
 0x90a PF: > { %p2897_p4 = scmp.ge.s32.totalorder %s3347_s15, 2  ;;  %s2415_s20 = sand.u32 1, %s3335_s12  }
 0x90b   : > { %p3752_p7 = scmp.ne.s32.totalorder %s3743_s23, 0  ;;  %s2416_s28 = scalar_lea.sflag [#allocation4], %s2415_s20 }
 0x90d   : > { %p2890_p8 = pnand %p2897_p4, %p3752_p7 }
 0x90f   : > { %3330 = dma.done.wait (!%p2890_p8), %s2416_s28, 256  }
 0x910   : > { %3332 = vsyncadd (!%p2890_p8), %s2416_s28, 4294967040  ;;  %p15_p11 = scmp.ge.s32.totalorder %s3404_s18, 4   ;;  %s3753_s12 = smov %s3339_s13 }
 0x911   : > { %s3754_s13 = smov %s3343_s14  ;;  %s3755_s14 = smov %s3415_s21 }
 0x912   : > { %s3756_s15 = smov %s3404_s18  ;;  %17 = sbr.rel (!%p15_p11) target bundleno = 5 (0x5), region = 81 }
 0x919   :  { %2421 = vsyncpa [#allocation3], 1 }
 0x91a   :  { %2423 = vsyncpa [#allocation3 + $0x1], 1 }
 0x91b   :  { %2424 = vsyncpa [#allocation6], 1 }
 0x91c   :  { %2425 = vsyncpa [#allocation4], 1 }
 0x91d   :  { %2427 = vsyncpa [#allocation4 + $0x1], 1 }

</bundles_post_ra>
